<compile_context>
chip_gen: v5e
topology: v5e:2x2
jax: 0.10.0
libtpu: 0.0.40
codegen_flags: <defaults>
</compile_context>

<pallas_src>
import functools

import jax
import jax.numpy as jnp
from jax.experimental import pallas as pl
from jax.experimental.pallas import tpu as pltpu

LN_EPS = 1e-5  # torch.nn.LayerNorm default


def _feed_forward_kernel(x_ref, w1_ref, b1_ref, w2_ref, b2_ref, g_ref, beta_ref, o_ref):
    """One row-tile of the feed-forward block, fully fused.

    x_ref:  (tm, D)    input token rows (native dtype, goes straight to the MXU)
    w1_ref: (D, H)     fc1 weight (transposed vs torch's (H, D))
    b1_ref: (1, H)     fc1 bias
    w2_ref: (H, D)     fc2 weight (transposed vs torch's (D, H))
    b2_ref: (1, D)     fc2 bias
    g_ref:  (1, D)     layer-norm gamma
    beta_ref: (1, D)   layer-norm beta
    o_ref:  (tm, D)    output rows
    """
    x = x_ref[...]  # keep native dtype for the MXU (bf16 path if params are bf16)

    # fc1 (+bias, relu).  MXU accumulates in f32; post-matmul math stays f32.
    h = jnp.dot(x, w1_ref[...], preferred_element_type=jnp.float32)
    h = jnp.maximum(h + b1_ref[...].astype(jnp.float32), 0.0)

    # fc2.  Cast the intermediate to the weight dtype so bf16 weights hit the
    # fast bf16 MXU path (no-op when everything is f32).
    y = jnp.dot(h.astype(w2_ref.dtype), w2_ref[...], preferred_element_type=jnp.float32)
    y = y + b2_ref[...].astype(jnp.float32)

    # residual add in f32
    y = y + x.astype(jnp.float32)

    # layer norm over the last dim (biased variance, eps=1e-5, like torch.nn.LayerNorm)
    mean = jnp.mean(y, axis=-1, keepdims=True)
    centered = y - mean
    var = jnp.mean(centered * centered, axis=-1, keepdims=True)
    out = centered * jax.lax.rsqrt(var + LN_EPS)
    out = out * g_ref[...].astype(jnp.float32) + beta_ref[...].astype(jnp.float32)

    o_ref[...] = out.astype(o_ref.dtype)


@functools.partial(jax.jit, static_argnames=("row_tile",))
def feed_forward(x, w1, b1, w2, b2, gamma, beta, *, row_tile=256):
    """x: (B, S, D). w1: (D, H), w2: (H, D). Returns (B, S, D).

    Rows are padded up to a multiple of `row_tile`, so any B*S works.
    For very large H (>= 4096) consider lowering row_tile to ~256 to keep the
    (row_tile, H) f32 intermediate small.
    """
    B, S, D = x.shape
    Din, H = w1.shape
    assert Din == D and w2.shape == (H, D)

    n_rows = B * S
    padded_rows = ((n_rows + row_tile - 1) // row_tile) * row_tile

    x2d = x.reshape(n_rows, D)
    if padded_rows != n_rows:
        x2d = jnp.pad(x2d, ((0, padded_rows - n_rows), (0, 0)))

    b1_2d = b1.reshape(1, H)
    b2_2d = b2.reshape(1, D)
    g_2d = gamma.reshape(1, D)
    beta_2d = beta.reshape(1, D)

    grid = (padded_rows // row_tile,)

    # --- VMEM budget: x/out tiles double-buffered, whole weights resident
    # (constant index_map -> DMA'd once), plus f32 intermediates. 1.5x margin,
    # floor 32 MiB, capped at 64 MiB so it also fits v7x's per-TC VMEM.
    isz_x = x.dtype.itemsize
    isz_w1 = w1.dtype.itemsize
    isz_w2 = w2.dtype.itemsize
    weight_bytes = 2 * D * H * isz_w1 + 2 * H * D * isz_w2          # (double-buffer worst case)
    tile_bytes = 4 * row_tile * D * isz_x                           # x + out, double-buffered
    interm_bytes = row_tile * H * 4 + 4 * row_tile * D * 4          # h + LN temporaries (f32)
    small_bytes = 2 * (H + 3 * D) * 4
    vmem_limit = int(1.5 * (weight_bytes + tile_bytes + interm_bytes + small_bytes))
    vmem_limit = min(max(vmem_limit, 32 << 20), 64 << 20)

    # --- advisory cost estimate for XLA scheduling around the call
    flops = 2 * padded_rows * D * H * 2 + padded_rows * (H + 8 * D)
    cost = pl.CostEstimate(
        flops=int(flops),
        transcendentals=int(padded_rows),  # one rsqrt per row
        bytes_accessed=int(
            2 * padded_rows * D * isz_x + D * H * isz_w1 + H * D * isz_w2 + (H + 3 * D) * 4
        ),
    )

    out2d = pl.pallas_call(
        _feed_forward_kernel,
        out_shape=jax.ShapeDtypeStruct((padded_rows, D), x.dtype),
        grid_spec=pltpu.PrefetchScalarGridSpec(
            num_scalar_prefetch=0,
            grid=grid,
            in_specs=[
                pl.BlockSpec((row_tile, D), lambda i: (i, 0)),  # x rows
                pl.BlockSpec((D, H), lambda i: (0, 0)),          # w1 (whole, resident)
                pl.BlockSpec((1, H), lambda i: (0, 0)),          # b1
                pl.BlockSpec((H, D), lambda i: (0, 0)),          # w2 (whole, resident)
                pl.BlockSpec((1, D), lambda i: (0, 0)),          # b2
                pl.BlockSpec((1, D), lambda i: (0, 0)),          # gamma
                pl.BlockSpec((1, D), lambda i: (0, 0)),          # beta
            ],
            out_specs=pl.BlockSpec((row_tile, D), lambda i: (i, 0)),
        ),
        compiler_params=pltpu.CompilerParams(
            dimension_semantics=("parallel",),
            vmem_limit_bytes=vmem_limit,
        ),
        cost_estimate=cost,
    )(x2d, w1, b1_2d, w2, b2_2d, g_2d, beta_2d)

    return out2d[:n_rows].reshape(B, S, D)


def _reference(x, w1, b1, w2, b2, gamma, beta):
    h = jnp.maximum(x @ w1 + b1, 0.0)
    y = h @ w2 + b2
    y = y + x
    mean = jnp.mean(y, axis=-1, keepdims=True)
    var = jnp.mean((y - mean) ** 2, axis=-1, keepdims=True)
    return (y - mean) * jax.lax.rsqrt(var + LN_EPS) * gamma + beta


if __name__ == "__main__":
    # Residual add requires input_embedding_size == output_embedding_size.
    # Small but lane-friendly shapes (D, H multiples of 128).
    B, S = 2, 8
    D = 128          # input_embedding_size == output_embedding_size
    H = 256          # ff_hidden_dim

    key = jax.random.PRNGKey(0)
    kx, k1, kb1, k2, kb2 = jax.random.split(key, 5)

    x = jax.random.normal(kx, (B, S, D), dtype=jnp.float32)

    # Deterministic synthetic parameters (torch-Linear-like uniform init scale).
    bound1 = 1.0 / (D ** 0.5)
    bound2 = 1.0 / (H ** 0.5)
    w1 = jax.random.uniform(k1, (D, H), minval=-bound1, maxval=bound1, dtype=jnp.float32)
    b1 = jax.random.uniform(kb1, (H,), minval=-bound1, maxval=bound1, dtype=jnp.float32)
    w2 = jax.random.uniform(k2, (H, D), minval=-bound2, maxval=bound2, dtype=jnp.float32)
    b2 = jax.random.uniform(kb2, (D,), minval=-bound2, maxval=bound2, dtype=jnp.float32)
    gamma = jnp.ones((D,), dtype=jnp.float32)   # torch LayerNorm default weight
    beta = jnp.zeros((D,), dtype=jnp.float32)   # torch LayerNorm default bias

    out = feed_forward(x, w1, b1, w2, b2, gamma, beta)
    out = jax.block_until_ready(out)

    ref = _reference(x, w1, b1, w2, b2, gamma, beta)
    assert out.shape == (B, S, D)
    assert jnp.allclose(out, ref, atol=1e-4, rtol=1e-4), "mismatch vs reference"

    print("KERNEL_OK")
</pallas_src>

<mosaic_0001>
module attributes {stable_mosaic.version = 11 : i64} {
  func.func @_feed_forward_kernel(%arg0: i32, %arg1: memref<256x128xf32, #tpu.memory_space<vmem>>, %arg2: memref<128x256xf32, #tpu.memory_space<vmem>>, %arg3: memref<1x256xf32, #tpu.memory_space<vmem>>, %arg4: memref<256x128xf32, #tpu.memory_space<vmem>>, %arg5: memref<1x128xf32, #tpu.memory_space<vmem>>, %arg6: memref<1x128xf32, #tpu.memory_space<vmem>>, %arg7: memref<1x128xf32, #tpu.memory_space<vmem>>, %arg8: memref<256x128xf32, #tpu.memory_space<vmem>>) attributes {dimension_semantics = [#tpu.dimension_semantics<parallel>], iteration_bounds = array<i64: 1>, scalar_prefetch = 0 : i64, scratch_operands = 0 : i64, tpu.core_type = #tpu.core_type<tc>, window_params = [{transform_indices = @transform_0, window_bounds = array<i64: 256, 128>}, {pipeline_mode = #tpu.pipeline_mode<synchronous>, transform_indices = @transform_1, window_bounds = array<i64: 128, 256>}, {pipeline_mode = #tpu.pipeline_mode<synchronous>, transform_indices = @transform_2, window_bounds = array<i64: 1, 256>}, {pipeline_mode = #tpu.pipeline_mode<synchronous>, transform_indices = @transform_3, window_bounds = array<i64: 256, 128>}, {pipeline_mode = #tpu.pipeline_mode<synchronous>, transform_indices = @transform_4, window_bounds = array<i64: 1, 128>}, {pipeline_mode = #tpu.pipeline_mode<synchronous>, transform_indices = @transform_5, window_bounds = array<i64: 1, 128>}, {pipeline_mode = #tpu.pipeline_mode<synchronous>, transform_indices = @transform_6, window_bounds = array<i64: 1, 128>}, {transform_indices = @transform_7, window_bounds = array<i64: 256, 128>}]} {
    %c0 = arith.constant 0 : index
    %c0_0 = arith.constant 0 : index
    %0 = vector.load %arg1[%c0, %c0_0] : memref<256x128xf32, #tpu.memory_space<vmem>>, vector<256x128xf32>
    %c0_1 = arith.constant 0 : index
    %c0_2 = arith.constant 0 : index
    %1 = vector.load %arg2[%c0_1, %c0_2] : memref<128x256xf32, #tpu.memory_space<vmem>>, vector<128x256xf32>
    %cst = arith.constant dense<0.000000e+00> : vector<256x256xf32>
    %2 = tpu.matmul %0, %1, %cst {dimension_numbers = #tpu.dot_dimension_numbers<[1], [0], [0], [1], [0, 0, 1, 1], [], []>} : vector<256x128xf32>, vector<128x256xf32>, vector<256x256xf32> -> vector<256x256xf32>
    %c0_3 = arith.constant 0 : index
    %c0_4 = arith.constant 0 : index
    %3 = vector.load %arg3[%c0_3, %c0_4] : memref<1x256xf32, #tpu.memory_space<vmem>>, vector<1x256xf32>
    %4 = vector.broadcast %3 : vector<1x256xf32> to vector<256x256xf32>
    %5 = arith.addf %2, %4 : vector<256x256xf32>
    %cst_5 = arith.constant 0.000000e+00 : f32
    %6 = vector.broadcast %cst_5 : f32 to vector<256x256xf32>
    %7 = arith.maximumf %5, %6 : vector<256x256xf32>
    %c0_6 = arith.constant 0 : index
    %c0_7 = arith.constant 0 : index
    %8 = vector.load %arg4[%c0_6, %c0_7] : memref<256x128xf32, #tpu.memory_space<vmem>>, vector<256x128xf32>
    %cst_8 = arith.constant dense<0.000000e+00> : vector<256x128xf32>
    %9 = tpu.matmul %7, %8, %cst_8 {dimension_numbers = #tpu.dot_dimension_numbers<[1], [0], [0], [1], [0, 0, 1, 1], [], []>} : vector<256x256xf32>, vector<256x128xf32>, vector<256x128xf32> -> vector<256x128xf32>
    %c0_9 = arith.constant 0 : index
    %c0_10 = arith.constant 0 : index
    %10 = vector.load %arg5[%c0_9, %c0_10] : memref<1x128xf32, #tpu.memory_space<vmem>>, vector<1x128xf32>
    %11 = vector.broadcast %10 : vector<1x128xf32> to vector<256x128xf32>
    %12 = arith.addf %9, %11 : vector<256x128xf32>
    %13 = arith.addf %12, %0 : vector<256x128xf32>
    %cst_11 = arith.constant dense<0.000000e+00> : vector<256xf32>
    %14 = vector.multi_reduction <add>, %13, %cst_11 [1] : vector<256x128xf32> to vector<256xf32>
    %15 = vector.shape_cast %14 : vector<256xf32> to vector<256x1xf32>
    %cst_12 = arith.constant 1.280000e+02 : f32
    %16 = vector.broadcast %cst_12 : f32 to vector<256x1xf32>
    %17 = arith.divf %15, %16 : vector<256x1xf32>
    %18 = vector.broadcast %17 : vector<256x1xf32> to vector<256x128xf32>
    %19 = arith.subf %13, %18 : vector<256x128xf32>
    %20 = arith.mulf %19, %19 : vector<256x128xf32>
    %cst_13 = arith.constant dense<0.000000e+00> : vector<256xf32>
    %21 = vector.multi_reduction <add>, %20, %cst_13 [1] : vector<256x128xf32> to vector<256xf32>
    %22 = vector.shape_cast %21 : vector<256xf32> to vector<256x1xf32>
    %cst_14 = arith.constant 1.280000e+02 : f32
    %23 = vector.broadcast %cst_14 : f32 to vector<256x1xf32>
    %24 = arith.divf %22, %23 : vector<256x1xf32>
    %cst_15 = arith.constant 9.99999974E-6 : f32
    %25 = vector.broadcast %cst_15 : f32 to vector<256x1xf32>
    %26 = arith.addf %24, %25 : vector<256x1xf32>
    %27 = math.rsqrt %26 : vector<256x1xf32>
    %28 = vector.broadcast %27 : vector<256x1xf32> to vector<256x128xf32>
    %29 = arith.mulf %19, %28 : vector<256x128xf32>
    %c0_16 = arith.constant 0 : index
    %c0_17 = arith.constant 0 : index
    %30 = vector.load %arg6[%c0_16, %c0_17] : memref<1x128xf32, #tpu.memory_space<vmem>>, vector<1x128xf32>
    %31 = vector.broadcast %30 : vector<1x128xf32> to vector<256x128xf32>
    %32 = arith.mulf %29, %31 : vector<256x128xf32>
    %c0_18 = arith.constant 0 : index
    %c0_19 = arith.constant 0 : index
    %33 = vector.load %arg7[%c0_18, %c0_19] : memref<1x128xf32, #tpu.memory_space<vmem>>, vector<1x128xf32>
    %34 = vector.broadcast %33 : vector<1x128xf32> to vector<256x128xf32>
    %35 = arith.addf %32, %34 : vector<256x128xf32>
    %c0_20 = arith.constant 0 : index
    %c0_21 = arith.constant 0 : index
    %36 = vector.load %arg8[%c0_20, %c0_21] : memref<256x128xf32, #tpu.memory_space<vmem>>, vector<256x128xf32>
    tpu.vector_store %arg8[%c0_20, %c0_21], %35 {strides = array<i32>} : memref<256x128xf32, #tpu.memory_space<vmem>>, vector<256x128xf32>,
    return
  }
  func.func @transform_0(%arg0: i32) -> (i32, i32) {
    %c0_i32 = arith.constant 0 : i32
    %c0_i32_0 = arith.constant 0 : i32
    return %arg0, %c0_i32 : i32, i32
  }
  func.func @transform_1(%arg0: i32) -> (i32, i32) {
    %c0_i32 = arith.constant 0 : i32
    %c0_i32_0 = arith.constant 0 : i32
    %c0_i32_1 = arith.constant 0 : i32
    return %c0_i32, %c0_i32_0 : i32, i32
  }
  func.func @transform_2(%arg0: i32) -> (i32, i32) {
    %c0_i32 = arith.constant 0 : i32
    %c0_i32_0 = arith.constant 0 : i32
    %c0_i32_1 = arith.constant 0 : i32
    return %c0_i32, %c0_i32_0 : i32, i32
  }
  func.func @transform_3(%arg0: i32) -> (i32, i32) {
    %c0_i32 = arith.constant 0 : i32
    %c0_i32_0 = arith.constant 0 : i32
    %c0_i32_1 = arith.constant 0 : i32
    return %c0_i32, %c0_i32_0 : i32, i32
  }
  func.func @transform_4(%arg0: i32) -> (i32, i32) {
    %c0_i32 = arith.constant 0 : i32
    %c0_i32_0 = arith.constant 0 : i32
    %c0_i32_1 = arith.constant 0 : i32
    return %c0_i32, %c0_i32_0 : i32, i32
  }
  func.func @transform_5(%arg0: i32) -> (i32, i32) {
    %c0_i32 = arith.constant 0 : i32
    %c0_i32_0 = arith.constant 0 : i32
    %c0_i32_1 = arith.constant 0 : i32
    return %c0_i32, %c0_i32_0 : i32, i32
  }
  func.func @transform_6(%arg0: i32) -> (i32, i32) {
    %c0_i32 = arith.constant 0 : i32
    %c0_i32_0 = arith.constant 0 : i32
    %c0_i32_1 = arith.constant 0 : i32
    return %c0_i32, %c0_i32_0 : i32, i32
  }
  func.func @transform_7(%arg0: i32) -> (i32, i32) {
    %c0_i32 = arith.constant 0 : i32
    %c0_i32_0 = arith.constant 0 : i32
    return %arg0, %c0_i32 : i32, i32
  }
}

</mosaic_0001>

<bundles_post_ra>
// kernel: feed_forward.1
= control target key start
LH: loop header
LB: loop body
LE: loop exit
PB: predicated region body
PF: predicated region fallthrough
CT: control target
= control target key end

     0   :  { %12 = vsyncpa [#allocation3], 0  ;;  %s1553_s27 = smov [#allocation2]   ;;  %s1554_s29 = smov 128   ;;  %s2594_s0 = inlined_call_operand.vmem [shape: f32[256,128], index: 0, kind: input, shape index: {}]   ;;  %s2595_s1 = inlined_call_operand.vmem [shape: f32[128,256], index: 1, kind: input, shape index: {}]   ;;  %s2596_s2 = inlined_call_operand.vmem [shape: f32[1,256], index: 2, kind: input, shape index: {}]   ;;  %s2597_s3 = inlined_call_operand.hbm [shape: f32[256,128], index: 3, kind: input, shape index: {}]   ;;  %s2598_s4 = inlined_call_operand.vmem [shape: f32[1,128], index: 4, kind: input, shape index: {}]   ;;  %s2599_s5 = inlined_call_operand.vmem [shape: f32[1,128], index: 5, kind: input, shape index: {}]   ;;  %s2600_s6 = inlined_call_operand.vmem [shape: f32[1,128], index: 6, kind: input, shape index: {}]   ;;  %s2601_s7 = inlined_call_operand.vmem [shape: f32[256,128], index: 7, kind: output, shape index: {}]  }
   0x1   :  { %s23_s26 = sshll.u32 %s2597_s3, 4  ;;  %s25_s28 = sshll.u32 %s1553_s27, 4  ;;  %s24_s26 = int_to_ptr.hbm [resolvable:$true] %s23_s26  ;;  %s26_s28 = int_to_ptr.vmem [resolvable:$true] %s25_s28 }
   0x2   :  { %s1555_s30 = smov 8  }
   0x3   :  { %31 = dma.hbm_to_vmem [thread:$0]  %s24_s26, 4096, %s26_s28, [#allocation3], %s1554_s29, %s1554_s29, %s1555_s30  }
   0x4   :  { %1551 = dma.done.wait [#allocation3], 4096  }
   0x5   :  { %1552 = vsyncadd [#allocation3], 4294963200  ;;  %v104_v0 = vld [vmem:[%s2595_s1 + $0xf0] sm:$0xff]  ;;  %v102_v1 = vld [vmem:[%s2595_s1 + $0xe0] sm:$0xff] }
   0x6   :  { %v105_v2 = vld [vmem:[%s2595_s1 + $0xf8] sm:$0xff]  ;;  %112 = vmatpush.msra.mxu0 %v104_v0  ;;  %v103_v3 = vld [vmem:[%s2595_s1 + $0xe8] sm:$0xff]  ;;  %v100_v4 = vld [vmem:[%s2595_s1 + $0xd0] sm:$0xff] }
   0x7   :  { %225 = vmatpush.msra.mxu1 %v105_v2  ;;  %v101_v5 = vld [vmem:[%s2595_s1 + $0xd8] sm:$0xff]  ;;  %v98_v6 = vld [vmem:[%s2595_s1 + $0xc0] sm:$0xff]  ;;  %v99_v7 = vld [vmem:[%s2595_s1 + $0xc8] sm:$0xff] }
   0x8   :  { %113 = vmatpush.msra.mxu0 %v102_v1  ;;  %v96_v8 = vld [vmem:[%s2595_s1 + $0xb0] sm:$0xff]  ;;  %v97_v9 = vld [vmem:[%s2595_s1 + $0xb8] sm:$0xff]  ;;  %v94_v10 = vld [vmem:[%s2595_s1 + $0xa0] sm:$0xff] }
   0x9   :  { %226 = vmatpush.msra.mxu1 %v103_v3  ;;  %v95_v11 = vld [vmem:[%s2595_s1 + $0xa8] sm:$0xff]  ;;  %v92_v12 = vld [vmem:[%s2595_s1 + $0x90] sm:$0xff]  ;;  %v93_v13 = vld [vmem:[%s2595_s1 + $0x98] sm:$0xff] }
   0xa   :  { %114 = vmatpush.msra.mxu0 %v100_v4  ;;  %v90_v14 = vld [vmem:[%s2595_s1 + $0x80] sm:$0xff]  ;;  %v91_v15 = vld [vmem:[%s2595_s1 + $0x88] sm:$0xff]  ;;  %v88_v16 = vld [vmem:[%s2595_s1 + $0x70] sm:$0xff] }
   0xb   :  { %227 = vmatpush.msra.mxu1 %v101_v5  ;;  %v89_v17 = vld [vmem:[%s2595_s1 + $0x78] sm:$0xff]  ;;  %v86_v18 = vld [vmem:[%s2595_s1 + $0x60] sm:$0xff]  ;;  %v87_v19 = vld [vmem:[%s2595_s1 + $0x68] sm:$0xff] }
   0xc   :  { %115 = vmatpush.msra.mxu0 %v98_v6  ;;  %v84_v20 = vld [vmem:[%s2595_s1 + $0x50] sm:$0xff]  ;;  %v85_v21 = vld [vmem:[%s2595_s1 + $0x58] sm:$0xff]  ;;  %v82_v22 = vld [vmem:[%s2595_s1 + $0x40] sm:$0xff] }
   0xd   :  { %228 = vmatpush.msra.mxu1 %v99_v7  ;;  %v83_v23 = vld [vmem:[%s2595_s1 + $0x48] sm:$0xff]  ;;  %v80_v24 = vld [vmem:[%s2595_s1 + $0x30] sm:$0xff]  ;;  %v81_v25 = vld [vmem:[%s2595_s1 + $0x38] sm:$0xff] }
   0xe   :  { %116 = vmatpush.msra.mxu0 %v96_v8  ;;  %v78_v26 = vld [vmem:[%s2595_s1 + $0x20] sm:$0xff]  ;;  %v79_v27 = vld [vmem:[%s2595_s1 + $0x28] sm:$0xff]  ;;  %v76_v28 = vld [vmem:[%s2595_s1 + $0x10] sm:$0xff] }
   0xf   :  { %229 = vmatpush.msra.mxu1 %v97_v9  ;;  %v77_v29 = vld [vmem:[%s2595_s1 + $0x18] sm:$0xff]  ;;  %v74_v30 = vld [vmem:[%s2595_s1] sm:$0xff]  ;;  %v75_v31 = vld [vmem:[%s2595_s1 + $0x8] sm:$0xff] }
  0x10   :  { %117 = vmatpush.msra.mxu0 %v94_v10  ;;  %v1699_v32 = vld [vmem:[%s2594_s0] sm:$0xff]  ;;  %v1706_v33 = vld [vmem:[%s2594_s0 + $0x8] sm:$0xff]  ;;  %v1713_v34 = vld [vmem:[%s2594_s0 + $0x10] sm:$0xff] }
  0x11   :  { %230 = vmatpush.msra.mxu1 %v95_v11  ;;  %v1720_v35 = vld [vmem:[%s2594_s0 + $0x18] sm:$0xff]  ;;  %v1727_v36 = vld [vmem:[%s2594_s0 + $0x20] sm:$0xff]  ;;  %v1734_v37 = vld [vmem:[%s2594_s0 + $0x28] sm:$0xff] }
  0x12   :  { %118 = vmatpush.msra.mxu0 %v92_v12  ;;  %v1741_v38 = vld [vmem:[%s2594_s0 + $0x30] sm:$0xff]  ;;  %v1748_v39 = vld [vmem:[%s2594_s0 + $0x38] sm:$0xff]  ;;  %v1755_v40 = vld [vmem:[%s2594_s0 + $0x40] sm:$0xff] }
  0x13   :  { %231 = vmatpush.msra.mxu1 %v93_v13  ;;  %v417_v41 = vld [vmem:[#allocation2 + $0x78] sm:$0xff]  ;;  %v416_v42 = vld [vmem:[#allocation2 + $0x70] sm:$0xff]  ;;  %v415_v45 = vld [vmem:[#allocation2 + $0x68] sm:$0xff] }
  0x14   :  { %119 = vmatpush.msra.mxu0 %v90_v14  ;;  %v433_v43 = vld [vmem:[#allocation2 + $0xf8] sm:$0xff]  ;;  %438 = vmatpush.msra.mxu2 %v417_v41  ;;  %v432_v44 = vld [vmem:[#allocation2 + $0xf0] sm:$0xff]  ;;  %v1762_v46 = vld [vmem:[%s2594_s0 + $0x48] sm:$0xff] }
  0x15   :  { %232 = vmatpush.msra.mxu1 %v91_v15  ;;  %551 = vmatpush.msra.mxu3 %v433_v43  ;;  %v414_v47 = vld [vmem:[#allocation2 + $0x60] sm:$0xff]  ;;  %v431_v48 = vld [vmem:[#allocation2 + $0xe8] sm:$0xff]  ;;  %v413_v49 = vld [vmem:[#allocation2 + $0x58] sm:$0xff] }
  0x16   :  { %120 = vmatpush.msra.mxu0 %v88_v16  ;;  %439 = vmatpush.msra.mxu2 %v416_v42  ;;  %v430_v50 = vld [vmem:[#allocation2 + $0xe0] sm:$0xff]  ;;  %v412_v51 = vld [vmem:[#allocation2 + $0x50] sm:$0xff]  ;;  %v429_v52 = vld [vmem:[#allocation2 + $0xd8] sm:$0xff] }
  0x17   :  { %233 = vmatpush.msra.mxu1 %v89_v17  ;;  %552 = vmatpush.msra.mxu3 %v432_v44  ;;  %v411_v53 = vld [vmem:[#allocation2 + $0x48] sm:$0xff]  ;;  %v428_v54 = vld [vmem:[#allocation2 + $0xd0] sm:$0xff]  ;;  %v410_v56 = vld [vmem:[#allocation2 + $0x40] sm:$0xff] }
  0x18   :  { %121 = vmatpush.msra.mxu0 %v86_v18  ;;  %440 = vmatpush.msra.mxu2 %v415_v45  ;;  %v1769_v55 = vld [vmem:[%s2594_s0 + $0x50] sm:$0xff]  ;;  %v427_v57 = vld [vmem:[#allocation2 + $0xc8] sm:$0xff]  ;;  %v409_v58 = vld [vmem:[#allocation2 + $0x38] sm:$0xff] }
  0x19   :  { %234 = vmatpush.msra.mxu1 %v87_v19  ;;  %553 = vmatpush.msra.mxu3 %v431_v48  ;;  %v426_v59 = vld [vmem:[#allocation2 + $0xc0] sm:$0xff]  ;;  %v408_v60 = vld [vmem:[#allocation2 + $0x30] sm:$0xff]  ;;  %v425_v61 = vld [vmem:[#allocation2 + $0xb8] sm:$0xff] }
  0x1a   :  { %122 = vmatpush.msra.mxu0 %v84_v20  ;;  %441 = vmatpush.msra.mxu2 %v414_v47  ;;  %v407_v62 = vld [vmem:[#allocation2 + $0x28] sm:$0xff]  ;;  %v424_v63 = vld [vmem:[#allocation2 + $0xb0] sm:$0xff]  ;;  %v1776_v0 = vld [vmem:[%s2594_s0 + $0x58] sm:$0xff] }
  0x1b   :  { %235 = vmatpush.msra.mxu1 %v85_v21  ;;  %554 = vmatpush.msra.mxu3 %v430_v50  ;;  %v406_v1 = vld [vmem:[#allocation2 + $0x20] sm:$0xff]  ;;  %v423_v2 = vld [vmem:[#allocation2 + $0xa8] sm:$0xff]  ;;  %v405_v3 = vld [vmem:[#allocation2 + $0x18] sm:$0xff] }
  0x1c   :  { %123 = vmatpush.msra.mxu0 %v82_v22  ;;  %442 = vmatpush.msra.mxu2 %v413_v49  ;;  %v422_v4 = vld [vmem:[#allocation2 + $0xa0] sm:$0xff]  ;;  %v404_v5 = vld [vmem:[#allocation2 + $0x10] sm:$0xff]  ;;  %v421_v6 = vld [vmem:[#allocation2 + $0x98] sm:$0xff] }
  0x1d   :  { %236 = vmatpush.msra.mxu1 %v83_v23  ;;  %555 = vmatpush.msra.mxu3 %v429_v52  ;;  %v1783_v7 = vld [vmem:[%s2594_s0 + $0x60] sm:$0xff]  ;;  %v403_v8 = vld [vmem:[#allocation2 + $0x8] sm:$0xff]  ;;  %v420_v9 = vld [vmem:[#allocation2 + $0x90] sm:$0xff] }
  0x1e   :  { %124 = vmatpush.msra.mxu0 %v80_v24  ;;  %443 = vmatpush.msra.mxu2 %v412_v51  ;;  %v402_v10 = vld [vmem:[#allocation2] sm:$0xff]  ;;  %v419_v11 = vld [vmem:[#allocation2 + $0x88] sm:$0xff]  ;;  %v1797_v14 = vld [vmem:[%s2594_s0 + $0x70] sm:$0xff] }
  0x1f   :  { %237 = vmatpush.msra.mxu1 %v81_v25  ;;  %556 = vmatpush.msra.mxu3 %v428_v54  ;;  %v418_v12 = vld [vmem:[#allocation2 + $0x80] sm:$0xff]  ;;  %v1790_v13 = vld [vmem:[%s2594_s0 + $0x68] sm:$0xff]  ;;  %v1804_v15 = vld [vmem:[%s2594_s0 + $0x78] sm:$0xff] }
  0x20   :  { %125 = vmatpush.msra.mxu0 %v78_v26  ;;  %444 = vmatpush.msra.mxu2 %v411_v53  ;;  %v106_v16 = vld [vmem:[%s2596_s2] sm:$0x3]  ;;  %v1836_v44 = vld [vmem:[%s2594_s0 + $0x90] sm:$0xff]  ;;  %v1845_v52 = vld [vmem:[%s2594_s0 + $0x98] sm:$0xff] }
  0x21   :  { %238 = vmatpush.msra.mxu1 %v79_v27  ;;  %557 = vmatpush.msra.mxu3 %v427_v57  ;;  %v1811_v17 = vperm.slane %v106_v16, 0  ;;  %v1813_v18 = vperm.slane %v106_v16, 1  ;;  %v1818_v21 = vld [vmem:[%s2594_s0 + $0x80] sm:$0xff] }
  0x22   :  { %126 = vmatpush.msra.mxu0 %v76_v28  ;;  %445 = vmatpush.msra.mxu2 %v410_v56  ;;  %v1827_v28 = vld [vmem:[%s2594_s0 + $0x88] sm:$0xff] }
  0x23   :  { %239 = vmatpush.msra.mxu1 %v77_v29  ;;  %558 = vmatpush.msra.mxu3 %v426_v59 }
  0x24   :  { %127 = vmatpush.msra.mxu0 %v74_v30  ;;  %446 = vmatpush.msra.mxu2 %v409_v58 }
  0x25   :  { %240 = vmatpush.msra.mxu1 %v75_v31  ;;  %128 = vmatmul.f32.vlgmr.msra.gmra.mxu0 %v1699_v32 }
  0x26   :  { %241 = vmatmul.f32.vlgmr.msra.gmra.mxu1 %v1699_v32  ;;  %447 = vmatpush.msra.mxu2 %v408_v60  ;;  %v1854_v60 = vld [vmem:[%s2594_s0 + $0xa0] sm:$0xff] }
  0x27   :  { %559 = vmatpush.msra.mxu3 %v425_v61 }
  0x28   :  { %448 = vmatpush.msra.mxu2 %v407_v62 }
  0x29   :  { %560 = vmatpush.msra.mxu3 %v424_v63 }
  0x2a   :  { %449 = vmatpush.msra.mxu2 %v406_v1 }
  0x2b   :  { %561 = vmatpush.msra.mxu3 %v423_v2 }
  0x2c   :  { %450 = vmatpush.msra.mxu2 %v405_v3 }
  0x2d   :  { %131 = vmatmul.f32.gmra.mxu0 %v1706_v33  ;;  %562 = vmatpush.msra.mxu3 %v422_v4  ;;  %v1863_v4 = vld [vmem:[%s2594_s0 + $0xa8] sm:$0xff] }
  0x2e   :  { %244 = vmatmul.f32.gmra.mxu1 %v1706_v33  ;;  %451 = vmatpush.msra.mxu2 %v404_v5 }
  0x2f   :  { %563 = vmatpush.msra.mxu3 %v421_v6 }
  0x30   :  { %452 = vmatpush.msra.mxu2 %v403_v8 }
  0x31   :  { %564 = vmatpush.msra.mxu3 %v420_v9 }
  0x32   :  { %453 = vmatpush.msra.mxu2 %v402_v10 }
  0x33   :  { %565 = vmatpush.msra.mxu3 %v419_v11 }
  0x35   :  { %134 = vmatmul.f32.gmra.mxu0 %v1713_v34  ;;  %566 = vmatpush.msra.mxu3 %v418_v12  ;;  %v1872_v12 = vld [vmem:[%s2594_s0 + $0xb0] sm:$0xff] }
  0x36   :  { %247 = vmatmul.f32.gmra.mxu1 %v1713_v34 }
  0x3d   :  { %137 = vmatmul.f32.gmra.mxu0 %v1720_v35 }
  0x3e   :  { %250 = vmatmul.f32.gmra.mxu1 %v1720_v35 }
  0x45   :  { %140 = vmatmul.f32.gmra.mxu0 %v1727_v36 }
  0x46   :  { %253 = vmatmul.f32.gmra.mxu1 %v1727_v36 }
  0x4d   :  { %143 = vmatmul.f32.gmra.mxu0 %v1734_v37 }
  0x4e   :  { %256 = vmatmul.f32.gmra.mxu1 %v1734_v37 }
  0x55   :  { %146 = vmatmul.f32.gmra.mxu0 %v1741_v38 }
  0x56   :  { %259 = vmatmul.f32.gmra.mxu1 %v1741_v38 }
  0x5d   :  { %149 = vmatmul.f32.gmra.mxu0 %v1748_v39 }
  0x5e   :  { %262 = vmatmul.f32.gmra.mxu1 %v1748_v39 }
  0x65   :  { %152 = vmatmul.f32.gmra.mxu0 %v1755_v40 }
  0x66   :  { %265 = vmatmul.f32.gmra.mxu1 %v1755_v40 }
  0x6d   :  { %155 = vmatmul.f32.gmra.mxu0 %v1762_v46 }
  0x6e   :  { %268 = vmatmul.f32.gmra.mxu1 %v1762_v46 }
  0x75   :  { %158 = vmatmul.f32.gmra.mxu0 %v1769_v55 }
  0x76   :  { %271 = vmatmul.f32.gmra.mxu1 %v1769_v55 }
  0x7d   :  { %161 = vmatmul.f32.gmra.mxu0 %v1776_v0 }
  0x7e   :  { %274 = vmatmul.f32.gmra.mxu1 %v1776_v0 }
  0x85   :  { %164 = vmatmul.f32.gmra.mxu0 %v1783_v7 }
  0x86   :  { %277 = vmatmul.f32.gmra.mxu1 %v1783_v7 }
  0x8d   :  { %167 = vmatmul.f32.gmra.mxu0 %v1790_v13 }
  0x8e   :  { %280 = vmatmul.f32.gmra.mxu1 %v1790_v13 }
  0x95   :  { %170 = vmatmul.f32.gmra.mxu0 %v1797_v14 }
  0x96   :  { %283 = vmatmul.f32.gmra.mxu1 %v1797_v14 }
  0x9d   :  { %173 = vmatmul.f32.gmra.mxu0 %v1804_v15 }
  0x9e   :  { %286 = vmatmul.f32.gmra.mxu1 %v1804_v15 }
  0xa2   :  { %v129_v19 = vpop.f32.mrf.mxu0 }
  0xa3   :  { %v242_v20 = vpop.f32.mrf.mxu1  ;;  %v130_v22 = vadd.f32 %v129_v19, %v1811_v17 }
  0xa4   :  { %v243_v23 = vadd.f32 %v242_v20, %v1813_v18 }
  0xa5   :  { %176 = vmatmul.f32.gmra.mxu0 %v1818_v21  ;;  %v338_v24 = vmax.f32 %v130_v22, 0.0 }
  0xa6   :  { %289 = vmatmul.f32.gmra.mxu1 %v1818_v21  ;;  %v339_v25 = vmax.f32 %v243_v23, 0.0 }
  0xa7   :  { %454 = vmatmul.f32.vlgmr.msra.gmra.mxu2 %v338_v24 }
  0xa8   :  { %567 = vmatmul.f32.vlgmr.msra.gmra.mxu3 %v339_v25  ;;  %v1881_v25 = vld [vmem:[%s2594_s0 + $0xb8] sm:$0xff] }
  0xaa   :  { %v132_v26 = vpop.f32.mrf.mxu0 }
  0xab   :  { %v245_v27 = vpop.f32.mrf.mxu1  ;;  %v133_v29 = vadd.f32 %v132_v26, %v1811_v17 }
  0xac   :  { %v246_v30 = vadd.f32 %v245_v27, %v1813_v18 }
  0xad   :  { %179 = vmatmul.f32.gmra.mxu0 %v1827_v28  ;;  %v340_v31 = vmax.f32 %v133_v29, 0.0 }
  0xae   :  { %292 = vmatmul.f32.gmra.mxu1 %v1827_v28  ;;  %v341_v41 = vmax.f32 %v246_v30, 0.0 }
  0xaf   :  { %457 = vmatmul.f32.gmra.mxu2 %v340_v31 }
  0xb0   :  { %570 = vmatmul.f32.gmra.mxu3 %v341_v41 }
  0xb2   :  { %v135_v42 = vpop.f32.mrf.mxu0 }
  0xb3   :  { %v248_v43 = vpop.f32.mrf.mxu1  ;;  %v136_v45 = vadd.f32 %v135_v42, %v1811_v17  ;;  %v1890_v42 = vld [vmem:[%s2594_s0 + $0xc0] sm:$0xff] }
  0xb4   :  { %v249_v47 = vadd.f32 %v248_v43, %v1813_v18 }
  0xb5   :  { %182 = vmatmul.f32.gmra.mxu0 %v1836_v44  ;;  %v342_v48 = vmax.f32 %v136_v45, 0.0 }
  0xb6   :  { %295 = vmatmul.f32.gmra.mxu1 %v1836_v44  ;;  %v343_v49 = vmax.f32 %v249_v47, 0.0 }
  0xb7   :  { %460 = vmatmul.f32.gmra.mxu2 %v342_v48 }
  0xb8   :  { %573 = vmatmul.f32.gmra.mxu3 %v343_v49 }
  0xba   :  { %v138_v50 = vpop.f32.mrf.mxu0 }
  0xbb   :  { %v251_v51 = vpop.f32.mrf.mxu1  ;;  %v139_v53 = vadd.f32 %v138_v50, %v1811_v17 }
  0xbc   :  { %v252_v54 = vadd.f32 %v251_v51, %v1813_v18  ;;  %v1899_v51 = vld [vmem:[%s2594_s0 + $0xc8] sm:$0xff] }
  0xbd   :  { %185 = vmatmul.f32.gmra.mxu0 %v1845_v52  ;;  %v344_v56 = vmax.f32 %v139_v53, 0.0 }
  0xbe   :  { %298 = vmatmul.f32.gmra.mxu1 %v1845_v52  ;;  %v345_v57 = vmax.f32 %v252_v54, 0.0 }
  0xbf   :  { %463 = vmatmul.f32.gmra.mxu2 %v344_v56 }
  0xc0   :  { %576 = vmatmul.f32.gmra.mxu3 %v345_v57 }
  0xc2   :  { %v141_v58 = vpop.f32.mrf.mxu0 }
  0xc3   :  { %v254_v59 = vpop.f32.mrf.mxu1  ;;  %v142_v61 = vadd.f32 %v141_v58, %v1811_v17 }
  0xc4   :  { %v255_v62 = vadd.f32 %v254_v59, %v1813_v18 }
  0xc5   :  { %188 = vmatmul.f32.gmra.mxu0 %v1854_v60  ;;  %v346_v63 = vmax.f32 %v142_v61, 0.0  ;;  %v1908_v61 = vld [vmem:[%s2594_s0 + $0xd0] sm:$0xff] }
  0xc6   :  { %301 = vmatmul.f32.gmra.mxu1 %v1854_v60  ;;  %v347_v1 = vmax.f32 %v255_v62, 0.0 }
  0xc7   :  { %466 = vmatmul.f32.gmra.mxu2 %v346_v63 }
  0xc8   :  { %579 = vmatmul.f32.gmra.mxu3 %v347_v1 }
  0xca   :  { %v144_v2 = vpop.f32.mrf.mxu0 }
  0xcb   :  { %v257_v3 = vpop.f32.mrf.mxu1  ;;  %v145_v5 = vadd.f32 %v144_v2, %v1811_v17 }
  0xcc   :  { %v258_v6 = vadd.f32 %v257_v3, %v1813_v18 }
  0xcd   :  { %191 = vmatmul.f32.gmra.mxu0 %v1863_v4  ;;  %v348_v8 = vmax.f32 %v145_v5, 0.0 }
  0xce   :  { %304 = vmatmul.f32.gmra.mxu1 %v1863_v4  ;;  %v349_v9 = vmax.f32 %v258_v6, 0.0  ;;  %v1917_v6 = vld [vmem:[%s2594_s0 + $0xd8] sm:$0xff] }
  0xcf   :  { %469 = vmatmul.f32.gmra.mxu2 %v348_v8 }
  0xd0   :  { %582 = vmatmul.f32.gmra.mxu3 %v349_v9 }
  0xd2   :  { %v147_v10 = vpop.f32.mrf.mxu0 }
  0xd3   :  { %v260_v11 = vpop.f32.mrf.mxu1  ;;  %v148_v16 = vadd.f32 %v147_v10, %v1811_v17 }
  0xd4   :  { %v261_v19 = vadd.f32 %v260_v11, %v1813_v18 }
  0xd5   :  { %194 = vmatmul.f32.gmra.mxu0 %v1872_v12  ;;  %v350_v20 = vmax.f32 %v148_v16, 0.0 }
  0xd6   :  { %307 = vmatmul.f32.gmra.mxu1 %v1872_v12  ;;  %v351_v22 = vmax.f32 %v261_v19, 0.0 }
  0xd7   :  { %472 = vmatmul.f32.gmra.mxu2 %v350_v20  ;;  %v1926_v20 = vld [vmem:[%s2594_s0 + $0xe0] sm:$0xff] }
  0xd8   :  { %585 = vmatmul.f32.gmra.mxu3 %v351_v22 }
  0xda   :  { %v150_v23 = vpop.f32.mrf.mxu0 }
  0xdb   :  { %v263_v24 = vpop.f32.mrf.mxu1  ;;  %v151_v26 = vadd.f32 %v150_v23, %v1811_v17 }
  0xdc   :  { %v264_v27 = vadd.f32 %v263_v24, %v1813_v18 }
  0xdd   :  { %197 = vmatmul.f32.gmra.mxu0 %v1881_v25  ;;  %v352_v29 = vmax.f32 %v151_v26, 0.0 }
  0xde   :  { %310 = vmatmul.f32.gmra.mxu1 %v1881_v25  ;;  %v353_v30 = vmax.f32 %v264_v27, 0.0 }
  0xdf   :  { %475 = vmatmul.f32.gmra.mxu2 %v352_v29 }
  0xe0   :  { %588 = vmatmul.f32.gmra.mxu3 %v353_v30  ;;  %v1935_v30 = vld [vmem:[%s2594_s0 + $0xe8] sm:$0xff] }
  0xe2   :  { %v153_v31 = vpop.f32.mrf.mxu0 }
  0xe3   :  { %v266_v41 = vpop.f32.mrf.mxu1  ;;  %v154_v43 = vadd.f32 %v153_v31, %v1811_v17 }
  0xe4   :  { %v267_v45 = vadd.f32 %v266_v41, %v1813_v18 }
  0xe5   :  { %v354_v47 = vmax.f32 %v154_v43, 0.0  ;;  %200 = vmatmul.f32.gmra.mxu0 %v1890_v42 }
  0xe6   :  { %v355_v48 = vmax.f32 %v267_v45, 0.0  ;;  %313 = vmatmul.f32.gmra.mxu1 %v1890_v42 }
  0xe7   :  { %478 = vmatmul.f32.gmra.mxu2 %v354_v47 }
  0xe8   :  { %591 = vmatmul.f32.gmra.mxu3 %v355_v48 }
  0xea   :  { %v156_v49 = vpop.f32.mrf.mxu0 }
  0xeb   :  { %v269_v50 = vpop.f32.mrf.mxu1  ;;  %v157_v53 = vadd.f32 %v156_v49, %v1811_v17  ;;  %v1944_v49 = vld [vmem:[%s2594_s0 + $0xf0] sm:$0xff] }
  0xec   :  { %v270_v54 = vadd.f32 %v269_v50, %v1813_v18 }
  0xed   :  { %v356_v56 = vmax.f32 %v157_v53, 0.0  ;;  %203 = vmatmul.f32.gmra.mxu0 %v1899_v51 }
  0xee   :  { %v357_v57 = vmax.f32 %v270_v54, 0.0  ;;  %316 = vmatmul.f32.gmra.mxu1 %v1899_v51 }
  0xef   :  { %481 = vmatmul.f32.gmra.mxu2 %v356_v56 }
  0xf0   :  { %594 = vmatmul.f32.gmra.mxu3 %v357_v57 }
  0xf2   :  { %v159_v58 = vpop.f32.mrf.mxu0 }
  0xf3   :  { %v272_v59 = vpop.f32.mrf.mxu1  ;;  %v160_v62 = vadd.f32 %v159_v58, %v1811_v17 }
  0xf4   :  { %v273_v63 = vadd.f32 %v272_v59, %v1813_v18  ;;  %v1953_v59 = vld [vmem:[%s2594_s0 + $0xf8] sm:$0xff] }
  0xf5   :  { %v358_v1 = vmax.f32 %v160_v62, 0.0  ;;  %206 = vmatmul.f32.gmra.mxu0 %v1908_v61 }
  0xf6   :  { %v359_v2 = vmax.f32 %v273_v63, 0.0  ;;  %319 = vmatmul.f32.gmra.mxu1 %v1908_v61 }
  0xf7   :  { %484 = vmatmul.f32.gmra.mxu2 %v358_v1 }
  0xf8   :  { %597 = vmatmul.f32.gmra.mxu3 %v359_v2 }
  0xfa   :  { %v162_v3 = vpop.f32.mrf.mxu0 }
  0xfb   :  { %v275_v5 = vpop.f32.mrf.mxu1  ;;  %v163_v8 = vadd.f32 %v162_v3, %v1811_v17 }
  0xfc   :  { %v276_v9 = vadd.f32 %v275_v5, %v1813_v18 }
  0xfd   :  { %v360_v10 = vmax.f32 %v163_v8, 0.0  ;;  %209 = vmatmul.f32.gmra.mxu0 %v1917_v6 }
  0xfe   :  { %v361_v11 = vmax.f32 %v276_v9, 0.0  ;;  %322 = vmatmul.f32.gmra.mxu1 %v1917_v6 }
  0xff   :  { %487 = vmatmul.f32.gmra.mxu2 %v360_v10 }
 0x100   :  { %600 = vmatmul.f32.gmra.mxu3 %v361_v11 }
 0x102   :  { %v165_v16 = vpop.f32.mrf.mxu0 }
 0x103   :  { %v278_v19 = vpop.f32.mrf.mxu1  ;;  %v166_v22 = vadd.f32 %v165_v16, %v1811_v17  ;;  %v1964_v16 = vld [vmem:[%s2598_s4] ss:$0 sm:$0xff] }
 0x104   :  { %v279_v23 = vadd.f32 %v278_v19, %v1813_v18 }
 0x105   :  { %v362_v24 = vmax.f32 %v166_v22, 0.0  ;;  %212 = vmatmul.f32.gmra.mxu0 %v1926_v20 }
 0x106   :  { %v363_v26 = vmax.f32 %v279_v23, 0.0  ;;  %325 = vmatmul.f32.gmra.mxu1 %v1926_v20 }
 0x107   :  { %490 = vmatmul.f32.gmra.mxu2 %v362_v24 }
 0x108   :  { %603 = vmatmul.f32.gmra.mxu3 %v363_v26 }
 0x10a   :  { %v168_v27 = vpop.f32.mrf.mxu0 }
 0x10b   :  { %v281_v29 = vpop.f32.mrf.mxu1  ;;  %v169_v31 = vadd.f32 %v168_v27, %v1811_v17 }
 0x10c   :  { %v282_v41 = vadd.f32 %v281_v29, %v1813_v18 }
 0x10d   :  { %v364_v43 = vmax.f32 %v169_v31, 0.0  ;;  %215 = vmatmul.f32.gmra.mxu0 %v1935_v30 }
 0x10e   :  { %v365_v45 = vmax.f32 %v282_v41, 0.0  ;;  %328 = vmatmul.f32.gmra.mxu1 %v1935_v30 }
 0x10f   :  { %493 = vmatmul.f32.gmra.mxu2 %v364_v43 }
 0x110   :  { %606 = vmatmul.f32.gmra.mxu3 %v365_v45 }
 0x112   :  { %v171_v47 = vpop.f32.mrf.mxu0 }
 0x113   :  { %v284_v48 = vpop.f32.mrf.mxu1  ;;  %v172_v50 = vadd.f32 %v171_v47, %v1811_v17 }
 0x114   :  { %v285_v53 = vadd.f32 %v284_v48, %v1813_v18 }
 0x115   :  { %v366_v54 = vmax.f32 %v172_v50, 0.0  ;;  %218 = vmatmul.f32.gmra.mxu0 %v1944_v49 }
 0x116   :  { %v367_v56 = vmax.f32 %v285_v53, 0.0  ;;  %331 = vmatmul.f32.gmra.mxu1 %v1944_v49 }
 0x117   :  { %496 = vmatmul.f32.gmra.mxu2 %v366_v54 }
 0x118   :  { %609 = vmatmul.f32.gmra.mxu3 %v367_v56 }
 0x11a   :  { %v174_v57 = vpop.f32.mrf.mxu0 }
 0x11b   :  { %v287_v58 = vpop.f32.mrf.mxu1  ;;  %v175_v62 = vadd.f32 %v174_v57, %v1811_v17 }
 0x11c   :  { %v288_v63 = vadd.f32 %v287_v58, %v1813_v18 }
 0x11d   :  { %v368_v1 = vmax.f32 %v175_v62, 0.0  ;;  %221 = vmatmul.f32.gmra.mxu0 %v1953_v59 }
 0x11e   :  { %v369_v2 = vmax.f32 %v288_v63, 0.0  ;;  %334 = vmatmul.f32.gmra.mxu1 %v1953_v59 }
 0x11f   :  { %499 = vmatmul.f32.gmra.mxu2 %v368_v1 }
 0x120   :  { %612 = vmatmul.f32.gmra.mxu3 %v369_v2 }
 0x122   :  { %v177_v3 = vpop.f32.mrf.mxu0 }
 0x123   :  { %v290_v5 = vpop.f32.mrf.mxu1  ;;  %v178_v8 = vadd.f32 %v177_v3, %v1811_v17 }
 0x124   :  { %v291_v9 = vadd.f32 %v290_v5, %v1813_v18 }
 0x125   :  { %v370_v10 = vmax.f32 %v178_v8, 0.0 }
 0x126   :  { %v371_v11 = vmax.f32 %v291_v9, 0.0 }
 0x127   :  { %502 = vmatmul.f32.gmra.mxu2 %v370_v10 }
 0x128   :  { %615 = vmatmul.f32.gmra.mxu3 %v371_v11 }
 0x12a   :  { %v180_v19 = vpop.f32.mrf.mxu0  ;;  %v455_v22 = vpop.f32.mrf.mxu2 }
 0x12b   :  { %v181_v23 = vadd.f32 %v180_v19, %v1811_v17  ;;  %v456_v24 = vadd.f32 %v1964_v16, %v455_v22  ;;  %v293_v26 = vpop.f32.mrf.mxu1  ;;  %v568_v27 = vpop.f32.mrf.mxu3 }
 0x12c   :  { %v294_v29 = vadd.f32 %v293_v26, %v1813_v18 }
 0x12d   :  { %v372_v31 = vmax.f32 %v181_v23, 0.0  ;;  %v569_v41 = vadd.f32 %v568_v27, %v456_v24 }
 0x12e   :  { %v373_v43 = vmax.f32 %v294_v29, 0.0 }
 0x12f   :  { %505 = vmatmul.f32.gmra.mxu2 %v372_v31  ;;  %v1970_v45 = vadd.f32 %v569_v41, %v1699_v32 }
 0x130   :  { %618 = vmatmul.f32.gmra.mxu3 %v373_v43 }
 0x131   :  { %696 = vadd.xlane.f32.xlu0 %v1970_v45 }
 0x132   :  { %v183_v47 = vpop.f32.mrf.mxu0  ;;  %v458_v48 = vpop.f32.mrf.mxu2 }
 0x133   :  { %v184_v50 = vadd.f32 %v183_v47, %v1811_v17  ;;  %v459_v53 = vadd.f32 %v1964_v16, %v458_v48  ;;  %v296_v54 = vpop.f32.mrf.mxu1  ;;  %v571_v56 = vpop.f32.mrf.mxu3 }
 0x134   :  { %v297_v57 = vadd.f32 %v296_v54, %v1813_v18 }
 0x135   :  { %v374_v58 = vmax.f32 %v184_v50, 0.0  ;;  %v572_v62 = vadd.f32 %v571_v56, %v459_v53 }
 0x136   :  { %v375_v63 = vmax.f32 %v297_v57, 0.0 }
 0x137   :  { %508 = vmatmul.f32.gmra.mxu2 %v374_v58  ;;  %v1977_v32 = vadd.f32 %v572_v62, %v1706_v33 }
 0x138   :  { %621 = vmatmul.f32.gmra.mxu3 %v375_v63 }
 0x139   :  { %698 = vadd.xlane.f32.xlu0 %v1977_v32 }
 0x13a   :  { %v186_v1 = vpop.f32.mrf.mxu0  ;;  %v461_v2 = vpop.f32.mrf.mxu2 }
 0x13b   :  { %v187_v3 = vadd.f32 %v186_v1, %v1811_v17  ;;  %v462_v5 = vadd.f32 %v1964_v16, %v461_v2  ;;  %v299_v8 = vpop.f32.mrf.mxu1  ;;  %v574_v9 = vpop.f32.mrf.mxu3 }
 0x13c   :  { %v300_v10 = vadd.f32 %v299_v8, %v1813_v18 }
 0x13d   :  { %v376_v11 = vmax.f32 %v187_v3, 0.0  ;;  %v575_v19 = vadd.f32 %v574_v9, %v462_v5 }
 0x13e   :  { %v377_v22 = vmax.f32 %v300_v10, 0.0 }
 0x13f   :  { %511 = vmatmul.f32.gmra.mxu2 %v376_v11  ;;  %v1984_v33 = vadd.f32 %v575_v19, %v1713_v34 }
 0x140   :  { %624 = vmatmul.f32.gmra.mxu3 %v377_v22 }
 0x141   :  { %700 = vadd.xlane.f32.xlu1 %v1984_v33 }
 0x142   :  { %v189_v23 = vpop.f32.mrf.mxu0  ;;  %v464_v24 = vpop.f32.mrf.mxu2 }
 0x143   :  { %v190_v26 = vadd.f32 %v189_v23, %v1811_v17  ;;  %v465_v27 = vadd.f32 %v1964_v16, %v464_v24  ;;  %v302_v29 = vpop.f32.mrf.mxu1  ;;  %v577_v31 = vpop.f32.mrf.mxu3 }
 0x144   :  { %v303_v41 = vadd.f32 %v302_v29, %v1813_v18 }
 0x145   :  { %v378_v43 = vmax.f32 %v190_v26, 0.0  ;;  %v578_v47 = vadd.f32 %v577_v31, %v465_v27 }
 0x146   :  { %v379_v48 = vmax.f32 %v303_v41, 0.0 }
 0x147   :  { %514 = vmatmul.f32.gmra.mxu2 %v378_v43  ;;  %v1991_v34 = vadd.f32 %v578_v47, %v1720_v35 }
 0x148   :  { %627 = vmatmul.f32.gmra.mxu3 %v379_v48 }
 0x149   :  { %702 = vadd.xlane.f32.xlu1 %v1991_v34 }
 0x14a   :  { %v192_v50 = vpop.f32.mrf.mxu0  ;;  %v467_v53 = vpop.f32.mrf.mxu2 }
 0x14b   :  { %v193_v54 = vadd.f32 %v192_v50, %v1811_v17  ;;  %v468_v56 = vadd.f32 %v1964_v16, %v467_v53  ;;  %v305_v57 = vpop.f32.mrf.mxu1  ;;  %v580_v58 = vpop.f32.mrf.mxu3 }
 0x14c   :  { %v306_v62 = vadd.f32 %v305_v57, %v1813_v18 }
 0x14d   :  { %v380_v63 = vmax.f32 %v193_v54, 0.0  ;;  %v581_v1 = vadd.f32 %v580_v58, %v468_v56 }
 0x14e   :  { %v381_v2 = vmax.f32 %v306_v62, 0.0 }
 0x14f   :  { %517 = vmatmul.f32.gmra.mxu2 %v380_v63  ;;  %v1998_v35 = vadd.f32 %v581_v1, %v1727_v36 }
 0x150   :  { %630 = vmatmul.f32.gmra.mxu3 %v381_v2 }
 0x151   :  { %704 = vadd.xlane.f32.xlu2 %v1998_v35 }
 0x152   :  { %v195_v3 = vpop.f32.mrf.mxu0  ;;  %v470_v5 = vpop.f32.mrf.mxu2 }
 0x153   :  { %v196_v8 = vadd.f32 %v195_v3, %v1811_v17  ;;  %v471_v9 = vadd.f32 %v1964_v16, %v470_v5  ;;  %v308_v10 = vpop.f32.mrf.mxu1  ;;  %v583_v11 = vpop.f32.mrf.mxu3 }
 0x154   :  { %v309_v19 = vadd.f32 %v308_v10, %v1813_v18 }
 0x155   :  { %v382_v22 = vmax.f32 %v196_v8, 0.0  ;;  %v584_v23 = vadd.f32 %v583_v11, %v471_v9 }
 0x156   :  { %v383_v24 = vmax.f32 %v309_v19, 0.0 }
 0x157   :  { %520 = vmatmul.f32.gmra.mxu2 %v382_v22  ;;  %v2005_v36 = vadd.f32 %v584_v23, %v1734_v37 }
 0x158   :  { %633 = vmatmul.f32.gmra.mxu3 %v383_v24 }
 0x159   :  { %706 = vadd.xlane.f32.xlu2 %v2005_v36 }
 0x15a   :  { %v198_v26 = vpop.f32.mrf.mxu0  ;;  %v473_v27 = vpop.f32.mrf.mxu2 }
 0x15b   :  { %v199_v29 = vadd.f32 %v198_v26, %v1811_v17  ;;  %v474_v31 = vadd.f32 %v1964_v16, %v473_v27  ;;  %v311_v41 = vpop.f32.mrf.mxu1  ;;  %v586_v43 = vpop.f32.mrf.mxu3 }
 0x15c   :  { %v312_v47 = vadd.f32 %v311_v41, %v1813_v18 }
 0x15d   :  { %v384_v48 = vmax.f32 %v199_v29, 0.0  ;;  %v587_v50 = vadd.f32 %v586_v43, %v474_v31 }
 0x15e   :  { %v385_v53 = vmax.f32 %v312_v47, 0.0 }
 0x15f   :  { %523 = vmatmul.f32.gmra.mxu2 %v384_v48  ;;  %v2012_v37 = vadd.f32 %v587_v50, %v1741_v38 }
 0x160   :  { %636 = vmatmul.f32.gmra.mxu3 %v385_v53 }
 0x161   :  { %708 = vadd.xlane.f32.xlu0 %v2012_v37 }
 0x162   :  { %v201_v54 = vpop.f32.mrf.mxu0  ;;  %v476_v56 = vpop.f32.mrf.mxu2 }
 0x163   :  { %v202_v57 = vadd.f32 %v201_v54, %v1811_v17  ;;  %v477_v58 = vadd.f32 %v1964_v16, %v476_v56  ;;  %v314_v62 = vpop.f32.mrf.mxu1  ;;  %v589_v63 = vpop.f32.mrf.mxu3 }
 0x164   :  { %v315_v1 = vadd.f32 %v314_v62, %v1813_v18 }
 0x165   :  { %v386_v2 = vmax.f32 %v202_v57, 0.0  ;;  %v590_v3 = vadd.f32 %v589_v63, %v477_v58 }
 0x166   :  { %v387_v5 = vmax.f32 %v315_v1, 0.0 }
 0x167   :  { %526 = vmatmul.f32.gmra.mxu2 %v386_v2  ;;  %v2019_v38 = vadd.f32 %v590_v3, %v1748_v39 }
 0x168   :  { %639 = vmatmul.f32.gmra.mxu3 %v387_v5 }
 0x169   :  { %710 = vadd.xlane.f32.xlu1 %v2019_v38 }
 0x16a   :  { %v204_v8 = vpop.f32.mrf.mxu0  ;;  %v479_v9 = vpop.f32.mrf.mxu2 }
 0x16b   :  { %v205_v10 = vadd.f32 %v204_v8, %v1811_v17  ;;  %v480_v11 = vadd.f32 %v1964_v16, %v479_v9  ;;  %v317_v19 = vpop.f32.mrf.mxu1  ;;  %v592_v22 = vpop.f32.mrf.mxu3 }
 0x16c   :  { %v318_v23 = vadd.f32 %v317_v19, %v1813_v18 }
 0x16d   :  { %v388_v24 = vmax.f32 %v205_v10, 0.0  ;;  %v593_v26 = vadd.f32 %v592_v22, %v480_v11 }
 0x16e   :  { %v389_v27 = vmax.f32 %v318_v23, 0.0 }
 0x16f   :  { %529 = vmatmul.f32.gmra.mxu2 %v388_v24  ;;  %v2026_v39 = vadd.f32 %v593_v26, %v1755_v40 }
 0x170   :  { %642 = vmatmul.f32.gmra.mxu3 %v389_v27 }
 0x171   :  { %712 = vadd.xlane.f32.xlu2 %v2026_v39 }
 0x172   :  { %v207_v29 = vpop.f32.mrf.mxu0  ;;  %v482_v31 = vpop.f32.mrf.mxu2 }
 0x173   :  { %v208_v41 = vadd.f32 %v207_v29, %v1811_v17  ;;  %v483_v43 = vadd.f32 %v1964_v16, %v482_v31  ;;  %v320_v47 = vpop.f32.mrf.mxu1  ;;  %v595_v48 = vpop.f32.mrf.mxu3 }
 0x174   :  { %v321_v50 = vadd.f32 %v320_v47, %v1813_v18 }
 0x175   :  { %v390_v53 = vmax.f32 %v208_v41, 0.0  ;;  %v596_v54 = vadd.f32 %v595_v48, %v483_v43  ;;  %v1556_v41 = vmov 128.0  }
 0x176   :  { %v391_v56 = vmax.f32 %v321_v50, 0.0  ;;  %1459 = vrcp.f32 %v1556_v41 }
 0x177   :  { %532 = vmatmul.f32.gmra.mxu2 %v390_v53  ;;  %v2033_v40 = vadd.f32 %v596_v54, %v1762_v46 }
 0x178   :  { %645 = vmatmul.f32.gmra.mxu3 %v391_v56 }
 0x179   :  { %714 = vadd.xlane.f32.xlu0 %v2033_v40 }
 0x17a   :  { %v210_v57 = vpop.f32.mrf.mxu0  ;;  %v485_v58 = vpop.f32.mrf.mxu2 }
 0x17b   :  { %v211_v62 = vadd.f32 %v210_v57, %v1811_v17  ;;  %v486_v63 = vadd.f32 %v1964_v16, %v485_v58  ;;  %v323_v1 = vpop.f32.mrf.mxu1  ;;  %v598_v2 = vpop.f32.mrf.mxu3 }
 0x17c   :  { %v324_v3 = vadd.f32 %v323_v1, %v1813_v18 }
 0x17d   :  { %v392_v5 = vmax.f32 %v211_v62, 0.0  ;;  %v599_v8 = vadd.f32 %v598_v2, %v486_v63 }
 0x17e   :  { %v393_v9 = vmax.f32 %v324_v3, 0.0 }
 0x17f   :  { %535 = vmatmul.f32.gmra.mxu2 %v392_v5  ;;  %v2040_v46 = vadd.f32 %v599_v8, %v1769_v55 }
 0x180   :  { %648 = vmatmul.f32.gmra.mxu3 %v393_v9 }
 0x181   :  { %716 = vadd.xlane.f32.xlu1 %v2040_v46 }
 0x182   :  { %v213_v10 = vpop.f32.mrf.mxu0  ;;  %v488_v11 = vpop.f32.mrf.mxu2 }
 0x183   :  { %v214_v19 = vadd.f32 %v213_v10, %v1811_v17  ;;  %v489_v22 = vadd.f32 %v1964_v16, %v488_v11  ;;  %v326_v23 = vpop.f32.mrf.mxu1  ;;  %v601_v24 = vpop.f32.mrf.mxu3 }
 0x184   :  { %v327_v26 = vadd.f32 %v326_v23, %v1813_v18 }
 0x185   :  { %v394_v27 = vmax.f32 %v214_v19, 0.0  ;;  %v602_v29 = vadd.f32 %v601_v24, %v489_v22 }
 0x186   :  { %v395_v31 = vmax.f32 %v327_v26, 0.0 }
 0x187   :  { %538 = vmatmul.f32.gmra.mxu2 %v394_v27  ;;  %v2047_v55 = vadd.f32 %v602_v29, %v1776_v0  ;;  %v1460_v0 = vpop.eup %1459 }
 0x188   :  { %651 = vmatmul.f32.gmra.mxu3 %v395_v31  ;;  %v761_v3 = vmul.f32 128.0, %v1460_v0  ;;  %vm765_vm0 = vweird.f32 %v1460_v0 }
 0x189   :  { %718 = vadd.xlane.f32.xlu2 %v2047_v55 }
 0x18a   :  { %v216_v43 = vpop.f32.mrf.mxu0  ;;  %v491_v47 = vpop.f32.mrf.mxu2  ;;  %v762_v24 = vsub.f32 1.0, %v761_v3 }
 0x18b   :  { %v217_v48 = vadd.f32 %v216_v43, %v1811_v17  ;;  %v492_v50 = vadd.f32 %v1964_v16, %v491_v47  ;;  %v329_v53 = vpop.f32.mrf.mxu1  ;;  %v604_v54 = vpop.f32.mrf.mxu3 }
 0x18c   :  { %v330_v56 = vadd.f32 %v329_v53, %v1813_v18  ;;  %v763_v29 = vmul.f32 %v1460_v0, %v762_v24 }
 0x18d   :  { %v396_v57 = vmax.f32 %v217_v48, 0.0  ;;  %v605_v58 = vadd.f32 %v604_v54, %v492_v50 }
 0x18e   :  { %v397_v62 = vmax.f32 %v330_v56, 0.0  ;;  %v764_v56 = vadd.f32 %v1460_v0, %v763_v29 }
 0x18f   :  { %541 = vmatmul.f32.gmra.mxu2 %v396_v57  ;;  %v2054_v63 = vadd.f32 %v605_v58, %v1783_v7 }
 0x190   :  { %654 = vmatmul.f32.gmra.mxu3 %v397_v62 }
 0x191   :  { %720 = vadd.xlane.f32.xlu0 %v2054_v63 }
 0x192   :  { %v219_v1 = vpop.f32.mrf.mxu0  ;;  %v494_v2 = vpop.f32.mrf.mxu2 }
 0x193   :  { %v220_v5 = vadd.f32 %v219_v1, %v1811_v17  ;;  %v495_v8 = vadd.f32 %v1964_v16, %v494_v2  ;;  %v332_v9 = vpop.f32.mrf.mxu1  ;;  %v607_v10 = vpop.f32.mrf.mxu3 }
 0x194   :  { %v333_v11 = vadd.f32 %v332_v9, %v1813_v18 }
 0x195   :  { %v398_v19 = vmax.f32 %v220_v5, 0.0  ;;  %v608_v22 = vadd.f32 %v607_v10, %v495_v8 }
 0x196   :  { %v399_v23 = vmax.f32 %v333_v11, 0.0 }
 0x197   :  { %544 = vmatmul.f32.gmra.mxu2 %v398_v19  ;;  %v2061_v7 = vadd.f32 %v608_v22, %v1790_v13 }
 0x198   :  { %657 = vmatmul.f32.gmra.mxu3 %v399_v23 }
 0x199   :  { %722 = vadd.xlane.f32.xlu1 %v2061_v7 }
 0x19a   :  { %v222_v26 = vpop.f32.mrf.mxu0  ;;  %v497_v27 = vpop.f32.mrf.mxu2 }
 0x19b   :  { %v223_v31 = vadd.f32 %v222_v26, %v1811_v17  ;;  %v498_v41 = vadd.f32 %v1964_v16, %v497_v27  ;;  %v335_v43 = vpop.f32.mrf.mxu1  ;;  %v610_v47 = vpop.f32.mrf.mxu3  ;;  %v2071_v17 = vsel %vm765_vm0, %v1460_v0, %v764_v56 }
 0x19c   :  { %v336_v48 = vadd.f32 %v335_v43, %v1813_v18 }
 0x19d   :  { %v400_v50 = vmax.f32 %v223_v31, 0.0  ;;  %v611_v53 = vadd.f32 %v610_v47, %v498_v41 }
 0x19e   :  { %v401_v54 = vmax.f32 %v336_v48, 0.0 }
 0x19f   :  { %547 = vmatmul.f32.gmra.mxu2 %v400_v50  ;;  %v2068_v13 = vadd.f32 %v611_v53, %v1797_v14 }
 0x1a0   :  { %660 = vmatmul.f32.gmra.mxu3 %v401_v54 }
 0x1a1   :  { %724 = vadd.xlane.f32.xlu2 %v2068_v13 }
 0x1a2   :  { %v500_v57 = vpop.f32.mrf.mxu2 }
 0x1a3   :  { %v501_v58 = vadd.f32 %v1964_v16, %v500_v57  ;;  %v613_v62 = vpop.f32.mrf.mxu3 }
 0x1a4   :  { %v697_v1 = vpop.xlane.xlu0 %696 }
 0x1a5   :  { %v614_v18 = vadd.f32 %v613_v62, %v501_v58  ;;  %v767_v2 = vmul.f32 %v2071_v17, %v697_v1 }
 0x1a7   :  { %v2076_v3 = vsub.f32 %v1970_v45, %v767_v2  ;;  %v2079_v14 = vadd.f32 %v614_v18, %v1804_v15 }
 0x1a9   :  { %726 = vadd.xlane.f32.xlu0 %v2079_v14  ;;  %v831_v5 = vmul.f32 %v2076_v3, %v2076_v3 }
 0x1aa   :  { %v503_v0 = vpop.f32.mrf.mxu2 }
 0x1ab   :  { %v504_v8 = vadd.f32 %v1964_v16, %v503_v0  ;;  %863 = vadd.xlane.f32.xlu2 %v831_v5  ;;  %v616_v9 = vpop.f32.mrf.mxu3 }
 0x1ac   :  { %v699_v10 = vpop.xlane.xlu0 %698 }
 0x1ad   :  { %v617_v11 = vadd.f32 %v616_v9, %v504_v8  ;;  %v768_v19 = vmul.f32 %v2071_v17, %v699_v10 }
 0x1af   :  { %v2087_v45 = vsub.f32 %v1977_v32, %v768_v19  ;;  %v2090_v15 = vadd.f32 %v617_v11, %v1818_v21 }
 0x1b1   :  { %728 = vadd.xlane.f32.xlu1 %v2090_v15  ;;  %v832_v22 = vmul.f32 %v2087_v45, %v2087_v45 }
 0x1b2   :  { %v506_v23 = vpop.f32.mrf.mxu2 }
 0x1b3   :  { %v507_v24 = vadd.f32 %v1964_v16, %v506_v23  ;;  %865 = vadd.xlane.f32.xlu0 %v832_v22  ;;  %v619_v26 = vpop.f32.mrf.mxu3 }
 0x1b4   :  { %v701_v27 = vpop.xlane.xlu1 %700 }
 0x1b5   :  { %v620_v29 = vadd.f32 %v619_v26, %v507_v24  ;;  %v769_v31 = vmul.f32 %v2071_v17, %v701_v27 }
 0x1b7   :  { %v2098_v32 = vsub.f32 %v1984_v33, %v769_v31  ;;  %v2101_v21 = vadd.f32 %v620_v29, %v1827_v28 }
 0x1b9   :  { %730 = vadd.xlane.f32.xlu2 %v2101_v21  ;;  %v833_v41 = vmul.f32 %v2098_v32, %v2098_v32 }
 0x1ba   :  { %v509_v43 = vpop.f32.mrf.mxu2 }
 0x1bb   :  { %v510_v47 = vadd.f32 %v1964_v16, %v509_v43  ;;  %867 = vadd.xlane.f32.xlu1 %v833_v41  ;;  %v622_v48 = vpop.f32.mrf.mxu3 }
 0x1bc   :  { %v703_v50 = vpop.xlane.xlu1 %702 }
 0x1bd   :  { %v623_v53 = vadd.f32 %v622_v48, %v510_v47  ;;  %v770_v54 = vmul.f32 %v2071_v17, %v703_v50 }
 0x1bf   :  { %v2109_v33 = vsub.f32 %v1991_v34, %v770_v54  ;;  %v2112_v28 = vadd.f32 %v623_v53, %v1836_v44 }
 0x1c1   :  { %732 = vadd.xlane.f32.xlu0 %v2112_v28  ;;  %v834_v56 = vmul.f32 %v2109_v33, %v2109_v33 }
 0x1c2   :  { %v512_v57 = vpop.f32.mrf.mxu2 }
 0x1c3   :  { %v513_v58 = vadd.f32 %v1964_v16, %v512_v57  ;;  %869 = vadd.xlane.f32.xlu2 %v834_v56  ;;  %v625_v62 = vpop.f32.mrf.mxu3 }
 0x1c4   :  { %v705_v1 = vpop.xlane.xlu2 %704 }
 0x1c5   :  { %v626_v18 = vadd.f32 %v625_v62, %v513_v58  ;;  %v771_v2 = vmul.f32 %v2071_v17, %v705_v1 }
 0x1c7   :  { %v2120_v34 = vsub.f32 %v1998_v35, %v771_v2  ;;  %v2123_v44 = vadd.f32 %v626_v18, %v1845_v52 }
 0x1c9   :  { %734 = vadd.xlane.f32.xlu1 %v2123_v44  ;;  %v835_v5 = vmul.f32 %v2120_v34, %v2120_v34 }
 0x1ca   :  { %v515_v0 = vpop.f32.mrf.mxu2 }
 0x1cb   :  { %v516_v8 = vadd.f32 %v1964_v16, %v515_v0  ;;  %871 = vadd.xlane.f32.xlu0 %v835_v5  ;;  %v628_v9 = vpop.f32.mrf.mxu3 }
 0x1cc   :  { %v707_v10 = vpop.xlane.xlu2 %706 }
 0x1cd   :  { %v629_v11 = vadd.f32 %v628_v9, %v516_v8  ;;  %v772_v19 = vmul.f32 %v2071_v17, %v707_v10 }
 0x1cf   :  { %v2131_v35 = vsub.f32 %v2005_v36, %v772_v19  ;;  %v2134_v52 = vadd.f32 %v629_v11, %v1854_v60 }
 0x1d1   :  { %736 = vadd.xlane.f32.xlu2 %v2134_v52  ;;  %v836_v22 = vmul.f32 %v2131_v35, %v2131_v35 }
 0x1d2   :  { %v518_v23 = vpop.f32.mrf.mxu2 }
 0x1d3   :  { %v519_v24 = vadd.f32 %v1964_v16, %v518_v23  ;;  %873 = vadd.xlane.f32.xlu1 %v836_v22  ;;  %v631_v26 = vpop.f32.mrf.mxu3 }
 0x1d4   :  { %v709_v27 = vpop.xlane.xlu0 %708 }
 0x1d5   :  { %v632_v29 = vadd.f32 %v631_v26, %v519_v24  ;;  %v773_v31 = vmul.f32 %v2071_v17, %v709_v27 }
 0x1d7   :  { %v2142_v36 = vsub.f32 %v2012_v37, %v773_v31  ;;  %v2145_v60 = vadd.f32 %v632_v29, %v1863_v4 }
 0x1d9   :  { %738 = vadd.xlane.f32.xlu0 %v2145_v60  ;;  %v837_v41 = vmul.f32 %v2142_v36, %v2142_v36 }
 0x1da   :  { %v521_v43 = vpop.f32.mrf.mxu2 }
 0x1db   :  { %v522_v47 = vadd.f32 %v1964_v16, %v521_v43  ;;  %875 = vadd.xlane.f32.xlu2 %v837_v41  ;;  %v634_v48 = vpop.f32.mrf.mxu3 }
 0x1dc   :  { %v711_v50 = vpop.xlane.xlu1 %710 }
 0x1dd   :  { %v635_v53 = vadd.f32 %v634_v48, %v522_v47  ;;  %v774_v54 = vmul.f32 %v2071_v17, %v711_v50 }
 0x1df   :  { %v2153_v37 = vsub.f32 %v2019_v38, %v774_v54  ;;  %v2156_v4 = vadd.f32 %v635_v53, %v1872_v12 }
 0x1e1   :  { %740 = vadd.xlane.f32.xlu1 %v2156_v4  ;;  %v838_v56 = vmul.f32 %v2153_v37, %v2153_v37 }
 0x1e2   :  { %v524_v57 = vpop.f32.mrf.mxu2 }
 0x1e3   :  { %v525_v58 = vadd.f32 %v1964_v16, %v524_v57  ;;  %877 = vadd.xlane.f32.xlu0 %v838_v56  ;;  %v637_v62 = vpop.f32.mrf.mxu3 }
 0x1e4   :  { %v713_v1 = vpop.xlane.xlu2 %712 }
 0x1e5   :  { %v638_v18 = vadd.f32 %v637_v62, %v525_v58  ;;  %v775_v2 = vmul.f32 %v2071_v17, %v713_v1 }
 0x1e7   :  { %v2164_v38 = vsub.f32 %v2026_v39, %v775_v2  ;;  %v2167_v12 = vadd.f32 %v638_v18, %v1881_v25 }
 0x1e9   :  { %742 = vadd.xlane.f32.xlu2 %v2167_v12  ;;  %v839_v5 = vmul.f32 %v2164_v38, %v2164_v38 }
 0x1ea   :  { %v527_v0 = vpop.f32.mrf.mxu2 }
 0x1eb   :  { %v528_v8 = vadd.f32 %v1964_v16, %v527_v0  ;;  %879 = vadd.xlane.f32.xlu1 %v839_v5  ;;  %v640_v9 = vpop.f32.mrf.mxu3 }
 0x1ec   :  { %v715_v10 = vpop.xlane.xlu0 %714 }
 0x1ed   :  { %v641_v11 = vadd.f32 %v640_v9, %v528_v8  ;;  %v776_v19 = vmul.f32 %v2071_v17, %v715_v10 }
 0x1ef   :  { %v2175_v39 = vsub.f32 %v2033_v40, %v776_v19  ;;  %v2178_v25 = vadd.f32 %v641_v11, %v1890_v42 }
 0x1f1   :  { %744 = vadd.xlane.f32.xlu0 %v2178_v25  ;;  %v840_v22 = vmul.f32 %v2175_v39, %v2175_v39 }
 0x1f2   :  { %v530_v23 = vpop.f32.mrf.mxu2 }
 0x1f3   :  { %v531_v24 = vadd.f32 %v1964_v16, %v530_v23  ;;  %881 = vadd.xlane.f32.xlu2 %v840_v22  ;;  %v643_v26 = vpop.f32.mrf.mxu3 }
 0x1f4   :  { %v717_v27 = vpop.xlane.xlu1 %716 }
 0x1f5   :  { %v644_v29 = vadd.f32 %v643_v26, %v531_v24  ;;  %v777_v31 = vmul.f32 %v2071_v17, %v717_v27 }
 0x1f7   :  { %v2186_v40 = vsub.f32 %v2040_v46, %v777_v31  ;;  %v2189_v42 = vadd.f32 %v644_v29, %v1899_v51 }
 0x1f9   :  { %746 = vadd.xlane.f32.xlu1 %v2189_v42  ;;  %v841_v41 = vmul.f32 %v2186_v40, %v2186_v40 }
 0x1fa   :  { %v533_v43 = vpop.f32.mrf.mxu2 }
 0x1fb   :  { %v534_v47 = vadd.f32 %v1964_v16, %v533_v43  ;;  %883 = vadd.xlane.f32.xlu0 %v841_v41  ;;  %v646_v48 = vpop.f32.mrf.mxu3 }
 0x1fc   :  { %v719_v50 = vpop.xlane.xlu2 %718 }
 0x1fd   :  { %v647_v53 = vadd.f32 %v646_v48, %v534_v47  ;;  %v778_v54 = vmul.f32 %v2071_v17, %v719_v50 }
 0x1ff   :  { %v2197_v46 = vsub.f32 %v2047_v55, %v778_v54  ;;  %v2200_v51 = vadd.f32 %v647_v53, %v1908_v61 }
 0x201   :  { %748 = vadd.xlane.f32.xlu2 %v2200_v51  ;;  %v842_v56 = vmul.f32 %v2197_v46, %v2197_v46 }
 0x202   :  { %v536_v57 = vpop.f32.mrf.mxu2 }
 0x203   :  { %v537_v58 = vadd.f32 %v1964_v16, %v536_v57  ;;  %885 = vadd.xlane.f32.xlu1 %v842_v56  ;;  %v649_v62 = vpop.f32.mrf.mxu3 }
 0x204   :  { %v721_v1 = vpop.xlane.xlu0 %720 }
 0x205   :  { %v650_v18 = vadd.f32 %v649_v62, %v537_v58  ;;  %v779_v2 = vmul.f32 %v2071_v17, %v721_v1 }
 0x207   :  { %v2208_v55 = vsub.f32 %v2054_v63, %v779_v2  ;;  %v2211_v61 = vadd.f32 %v650_v18, %v1917_v6 }
 0x209   :  { %750 = vadd.xlane.f32.xlu0 %v2211_v61  ;;  %v843_v5 = vmul.f32 %v2208_v55, %v2208_v55 }
 0x20a   :  { %v539_v0 = vpop.f32.mrf.mxu2 }
 0x20b   :  { %v540_v8 = vadd.f32 %v1964_v16, %v539_v0  ;;  %887 = vadd.xlane.f32.xlu2 %v843_v5  ;;  %v652_v9 = vpop.f32.mrf.mxu3 }
 0x20c   :  { %v723_v10 = vpop.xlane.xlu1 %722 }
 0x20d   :  { %v653_v11 = vadd.f32 %v652_v9, %v540_v8  ;;  %v780_v19 = vmul.f32 %v2071_v17, %v723_v10 }
 0x20f   :  { %v2219_v63 = vsub.f32 %v2061_v7, %v780_v19  ;;  %v2222_v6 = vadd.f32 %v653_v11, %v1926_v20 }
 0x211   :  { %752 = vadd.xlane.f32.xlu1 %v2222_v6  ;;  %v844_v22 = vmul.f32 %v2219_v63, %v2219_v63 }
 0x212   :  { %v542_v23 = vpop.f32.mrf.mxu2 }
 0x213   :  { %v543_v24 = vadd.f32 %v1964_v16, %v542_v23  ;;  %889 = vadd.xlane.f32.xlu0 %v844_v22  ;;  %v655_v26 = vpop.f32.mrf.mxu3 }
 0x214   :  { %v725_v29 = vpop.xlane.xlu2 %724 }
 0x215   :  { %v656_v27 = vadd.f32 %v655_v26, %v543_v24 }
 0x217   :  { %v2229_v31 = vadd.f32 %v656_v27, %v1935_v30 }
 0x219   :  { %754 = vadd.xlane.f32.xlu2 %v2229_v31 }
 0x21a   :  { %v545_v7 = vpop.f32.mrf.mxu2 }
 0x21b   :  { %v546_v20 = vadd.f32 %v1964_v16, %v545_v7  ;;  %v658_v41 = vpop.f32.mrf.mxu3 }
 0x21c   :  { %v727_v43 = vpop.xlane.xlu0 %726 }
 0x21d   :  { %v659_v47 = vadd.f32 %v658_v41, %v546_v20  ;;  %v782_v48 = vmul.f32 %v2071_v17, %v727_v43 }
 0x21e   :  { %v864_v50 = vpop.xlane.xlu2 %863 }
 0x21f   :  { %v2235_v53 = vsub.f32 %v2079_v14, %v782_v48  ;;  %v927_v54 = vmul.f32 %v864_v50, %v2071_v17  ;;  %v2239_v56 = vadd.f32 %v659_v47, %v1944_v49  ;;  %v781_v49 = vmul.f32 %v2071_v17, %v725_v29  ;;  %v2267_v47 = vld [vmem:[%s2599_s5] ss:$0 sm:$0xff] }
 0x221   :  { %v959_v30 = vadd.f32 1e-05, %v927_v54  ;;  %756 = vadd.xlane.f32.xlu0 %v2239_v56  ;;  %v846_v57 = vmul.f32 %v2235_v53, %v2235_v53  ;;  %v2258_v22 = vsub.f32 %v2068_v13, %v781_v49 }
 0x222   :  { %v548_v58 = vpop.f32.mrf.mxu2 }
 0x223   :  { %1461 = vrsqrt.f32 %v959_v30  ;;  %v549_v62 = vadd.f32 %v1964_v16, %v548_v58  ;;  %893 = vadd.xlane.f32.xlu2 %v846_v57  ;;  %v661_v1 = vpop.f32.mrf.mxu3  ;;  %v845_v29 = vmul.f32 %v2258_v22, %v2258_v22  ;;  %vm997_vm2 = vweird.f32 %v959_v30  ;;  %v2275_v58 = vld [vmem:[%s2600_s6] ss:$0 sm:$0xff] }
 0x224   :  { %v729_v18 = vpop.xlane.xlu1 %728 }
 0x225   :  { %v662_v14 = vadd.f32 %v661_v1, %v549_v62  ;;  %v783_v2 = vmul.f32 %v2071_v17, %v729_v18 }
 0x226   :  { %v866_v5 = vpop.xlane.xlu0 %865 }
 0x227   :  { %v2248_v0 = vsub.f32 %v2090_v15, %v783_v2  ;;  %v928_v8 = vmul.f32 %v866_v5, %v2071_v17  ;;  %v2252_v9 = vadd.f32 %v662_v14, %v1953_v59 }
 0x229   :  { %v1462_v10 = vpop.eup %1461  ;;  %v960_v11 = vadd.f32 1e-05, %v928_v8  ;;  %758 = vadd.xlane.f32.xlu1 %v2252_v9  ;;  %v847_v16 = vmul.f32 %v2248_v0, %v2248_v0 }
 0x22a   :  { %v992_v19 = vmul.f32 %v1462_v10, %v959_v30  ;;  %vm998_vm1 = vweird.f32 %v1462_v10 }
 0x22b   :  { %1463 = vrsqrt.f32 %v960_v11  ;;  %895 = vadd.xlane.f32.xlu0 %v847_v16  ;;  %vm999_vm3 = vmor %vm997_vm2, %vm998_vm1  ;;  %vm1007_vm5 = vweird.f32 %v960_v11 }
 0x22c   :  { %v993_v15 = vmul.f32 %v1462_v10, %v992_v19  ;;  %v731_v23 = vpop.xlane.xlu2 %730 }
 0x22d   :  { %v784_v59 = vmul.f32 %v2071_v17, %v731_v23 }
 0x22e   :  { %v994_v24 = vmul.f32 0.5, %v993_v15  ;;  %v868_v26 = vpop.xlane.xlu1 %867 }
 0x22f   :  { %v929_v27 = vmul.f32 %v868_v26, %v2071_v17  ;;  %v2270_v48 = vsub.f32 %v2101_v21, %v784_v59 }
 0x230   :  { %v995_v7 = vsub.f32 1.5, %v994_v24 }
 0x231   :  { %v1464_v20 = vpop.eup %1463  ;;  %v961_v41 = vadd.f32 1e-05, %v929_v27  ;;  %891 = vadd.xlane.f32.xlu1 %v845_v29  ;;  %v848_v5 = vmul.f32 %v2270_v48, %v2270_v48 }
 0x232   :  { %v996_v13 = vmul.f32 %v1462_v10, %v995_v7  ;;  %v1002_v43 = vmul.f32 %v1464_v20, %v960_v11  ;;  %vm1008_vm4 = vweird.f32 %v1464_v20 }
 0x233   :  { %1465 = vrsqrt.f32 %v961_v41  ;;  %vm1009_vm6 = vmor %vm1007_vm5, %vm1008_vm4  ;;  %vm1017_vm8 = vweird.f32 %v961_v41 }
 0x234   :  { %v1000_v50 = vsel %vm999_vm3, %v1462_v10, %v996_v13  ;;  %v1003_v54 = vmul.f32 %v1464_v20, %v1002_v43  ;;  %v733_v57 = vpop.xlane.xlu0 %732 }
 0x235   :  { %v1311_v30 = vmul.f32 %v1000_v50, %v2076_v3  ;;  %v785_v62 = vmul.f32 %v2071_v17, %v733_v57 }
 0x236   :  { %v1004_v1 = vmul.f32 0.5, %v1003_v54  ;;  %v870_v18 = vpop.xlane.xlu2 %869 }
 0x237   :  { %v1347_v14 = vmul.f32 %v2267_v47, %v1311_v30  ;;  %v2281_v21 = vsub.f32 %v2112_v28, %v785_v62  ;;  %v930_v2 = vmul.f32 %v870_v18, %v2071_v17 }
 0x238   :  { %v1005_v49 = vsub.f32 1.5, %v1004_v1 }
 0x239   :  { %v1466_v8 = vpop.eup %1465  ;;  %v1383_v10 = vadd.f32 %v2275_v58, %v1347_v14  ;;  %v962_v3 = vadd.f32 1e-05, %v930_v2  ;;  %897 = vadd.xlane.f32.xlu1 %v848_v5  ;;  %v849_v16 = vmul.f32 %v2281_v21, %v2281_v21 }
 0x23a   :  { %v1006_v19 = vmul.f32 %v1464_v20, %v1005_v49  ;;  %v1012_v15 = vmul.f32 %v1466_v8, %v961_v41  ;;  %vm1018_vm7 = vweird.f32 %v1466_v8 }
 0x23b   :  { %1415 = vst [vmem:[%s2601_s7] sm:$0xff] %v1383_v10  ;;  %1467 = vrsqrt.f32 %v962_v3  ;;  %899 = vadd.xlane.f32.xlu2 %v849_v16  ;;  %vm1019_vm9 = vmor %vm1017_vm8, %vm1018_vm7  ;;  %vm1027_vm11 = vweird.f32 %v962_v3 }
 0x23c   :  { %v1010_v28 = vsel %vm1009_vm6, %v1464_v20, %v1006_v19  ;;  %v1013_v23 = vmul.f32 %v1466_v8, %v1012_v15  ;;  %v735_v24 = vpop.xlane.xlu1 %734 }
 0x23d   :  { %v1312_v26 = vmul.f32 %v1010_v28, %v2087_v45  ;;  %v786_v59 = vmul.f32 %v2071_v17, %v735_v24 }
 0x23e   :  { %v1014_v27 = vmul.f32 0.5, %v1013_v23  ;;  %v872_v29 = vpop.xlane.xlu0 %871 }
 0x23f   :  { %v1348_v7 = vmul.f32 %v2267_v47, %v1312_v26  ;;  %v2296_v11 = vsub.f32 %v2123_v44, %v786_v59  ;;  %v931_v13 = vmul.f32 %v872_v29, %v2071_v17 }
 0x240   :  { %v1015_v43 = vsub.f32 1.5, %v1014_v27 }
 0x241   :  { %v1468_v50 = vpop.eup %1467  ;;  %v1384_v20 = vadd.f32 %v2275_v58, %v1348_v7  ;;  %v963_v54 = vadd.f32 1e-05, %v931_v13  ;;  %v850_v45 = vmul.f32 %v2296_v11, %v2296_v11 }
 0x242   :  { %v1016_v57 = vmul.f32 %v1466_v8, %v1015_v43  ;;  %v1022_v30 = vmul.f32 %v1468_v50, %v962_v3  ;;  %vm1028_vm10 = vweird.f32 %v1468_v50 }
 0x243   :  { %1416 = vst [vmem:[%s2601_s7 + $0x8] sm:$0xff] %v1384_v20  ;;  %1469 = vrsqrt.f32 %v963_v54  ;;  %901 = vadd.xlane.f32.xlu0 %v850_v45  ;;  %vm1029_vm12 = vmor %vm1027_vm11, %vm1028_vm10  ;;  %vm1037_vm14 = vweird.f32 %v963_v54 }
 0x244   :  { %v1020_v44 = vsel %vm1019_vm9, %v1466_v8, %v1016_v57  ;;  %v1023_v62 = vmul.f32 %v1468_v50, %v1022_v30  ;;  %v737_v1 = vpop.xlane.xlu2 %736 }
 0x245   :  { %v1313_v18 = vmul.f32 %v1020_v44, %v2098_v32  ;;  %v787_v14 = vmul.f32 %v2071_v17, %v737_v1 }
 0x246   :  { %v1024_v2 = vmul.f32 0.5, %v1023_v62  ;;  %v874_v5 = vpop.xlane.xlu1 %873 }
 0x247   :  { %v1349_v49 = vmul.f32 %v2267_v47, %v1313_v18  ;;  %v2309_v41 = vsub.f32 %v2134_v52, %v787_v14  ;;  %v932_v10 = vmul.f32 %v874_v5, %v2071_v17 }
 0x248   :  { %v1025_v16 = vsub.f32 1.5, %v1024_v2 }
 0x249   :  { %v1470_v19 = vpop.eup %1469  ;;  %v1385_v8 = vadd.f32 %v2275_v58, %v1349_v49  ;;  %v964_v15 = vadd.f32 1e-05, %v932_v10  ;;  %v851_v32 = vmul.f32 %v2309_v41, %v2309_v41 }
 0x24a   :  { %v1026_v28 = vmul.f32 %v1468_v50, %v1025_v16  ;;  %v1032_v23 = vmul.f32 %v1470_v19, %v963_v54  ;;  %vm1038_vm13 = vweird.f32 %v1470_v19 }
 0x24b   :  { %1417 = vst [vmem:[%s2601_s7 + $0x10] sm:$0xff] %v1385_v8  ;;  %1471 = vrsqrt.f32 %v964_v15  ;;  %903 = vadd.xlane.f32.xlu1 %v851_v32  ;;  %vm1039_vm15 = vmor %vm1037_vm14, %vm1038_vm13  ;;  %vm1047_vm1 = vweird.f32 %v964_v15 }
 0x24c   :  { %v1030_v52 = vsel %vm1029_vm12, %v1468_v50, %v1026_v28  ;;  %v1033_v24 = vmul.f32 %v1470_v19, %v1032_v23  ;;  %v739_v26 = vpop.xlane.xlu0 %738 }
 0x24d   :  { %v1314_v59 = vmul.f32 %v1030_v52, %v2109_v33  ;;  %v788_v27 = vmul.f32 %v2071_v17, %v739_v26 }
 0x24e   :  { %v1034_v29 = vmul.f32 0.5, %v1033_v24  ;;  %v876_v7 = vpop.xlane.xlu2 %875 }
 0x24f   :  { %v1350_v13 = vmul.f32 %v2267_v47, %v1314_v59  ;;  %v2322_v3 = vsub.f32 %v2145_v60, %v788_v27  ;;  %v933_v43 = vmul.f32 %v876_v7, %v2071_v17 }
 0x250   :  { %v1035_v20 = vsub.f32 1.5, %v1034_v29 }
 0x251   :  { %v1472_v45 = vpop.eup %1471  ;;  %v1386_v50 = vadd.f32 %v2275_v58, %v1350_v13  ;;  %v965_v57 = vadd.f32 1e-05, %v933_v43  ;;  %v852_v33 = vmul.f32 %v2322_v3, %v2322_v3 }
 0x252   :  { %v1036_v30 = vmul.f32 %v1470_v19, %v1035_v20  ;;  %v1042_v44 = vmul.f32 %v1472_v45, %v964_v15  ;;  %vm1048_vm0 = vweird.f32 %v1472_v45 }
 0x253   :  { %1418 = vst [vmem:[%s2601_s7 + $0x18] sm:$0xff] %v1386_v50  ;;  %1473 = vrsqrt.f32 %v965_v57  ;;  %905 = vadd.xlane.f32.xlu2 %v852_v33  ;;  %vm1049_vm2 = vmor %vm1047_vm1, %vm1048_vm0  ;;  %vm1057_vm4 = vweird.f32 %v965_v57 }
 0x254   :  { %v1040_v60 = vsel %vm1039_vm15, %v1470_v19, %v1036_v30  ;;  %v1043_v62 = vmul.f32 %v1472_v45, %v1042_v44  ;;  %v741_v1 = vpop.xlane.xlu1 %740 }
 0x255   :  { %v1315_v18 = vmul.f32 %v1040_v60, %v2120_v34  ;;  %v789_v14 = vmul.f32 %v2071_v17, %v741_v1 }
 0x256   :  { %v1044_v2 = vmul.f32 0.5, %v1043_v62  ;;  %v878_v5 = vpop.xlane.xlu0 %877 }
 0x257   :  { %v1351_v49 = vmul.f32 %v2267_v47, %v1315_v18  ;;  %v2335_v54 = vsub.f32 %v2156_v4, %v789_v14  ;;  %v934_v10 = vmul.f32 %v878_v5, %v2071_v17 }
 0x258   :  { %v1045_v16 = vsub.f32 1.5, %v1044_v2 }
 0x259   :  { %v1474_v8 = vpop.eup %1473  ;;  %v1387_v19 = vadd.f32 %v2275_v58, %v1351_v49  ;;  %v966_v32 = vadd.f32 1e-05, %v934_v10  ;;  %v853_v34 = vmul.f32 %v2335_v54, %v2335_v54 }
 0x25a   :  { %v1046_v28 = vmul.f32 %v1472_v45, %v1045_v16  ;;  %v1052_v23 = vmul.f32 %v1474_v8, %v965_v57  ;;  %vm1058_vm3 = vweird.f32 %v1474_v8 }
 0x25b   :  { %1419 = vst [vmem:[%s2601_s7 + $0x20] sm:$0xff] %v1387_v19  ;;  %1475 = vrsqrt.f32 %v966_v32  ;;  %907 = vadd.xlane.f32.xlu0 %v853_v34  ;;  %vm1059_vm5 = vmor %vm1057_vm4, %vm1058_vm3  ;;  %vm1067_vm7 = vweird.f32 %v966_v32 }
 0x25c   :  { %v1050_v4 = vsel %vm1049_vm2, %v1472_v45, %v1046_v28  ;;  %v1053_v52 = vmul.f32 %v1474_v8, %v1052_v23  ;;  %v743_v24 = vpop.xlane.xlu2 %742 }
 0x25d   :  { %v1316_v26 = vmul.f32 %v1050_v4, %v2131_v35  ;;  %v790_v59 = vmul.f32 %v2071_v17, %v743_v24 }
 0x25e   :  { %v1054_v27 = vmul.f32 0.5, %v1053_v52  ;;  %v880_v29 = vpop.xlane.xlu1 %879 }
 0x25f   :  { %v1352_v7 = vmul.f32 %v2267_v47, %v1316_v26  ;;  %v2348_v15 = vsub.f32 %v2167_v12, %v790_v59  ;;  %v935_v13 = vmul.f32 %v880_v29, %v2071_v17 }
 0x260   :  { %v1055_v43 = vsub.f32 1.5, %v1054_v27 }
 0x261   :  { %v1476_v20 = vpop.eup %1475  ;;  %v1388_v45 = vadd.f32 %v2275_v58, %v1352_v7  ;;  %v967_v50 = vadd.f32 1e-05, %v935_v13  ;;  %v854_v35 = vmul.f32 %v2348_v15, %v2348_v15 }
 0x262   :  { %v1056_v33 = vmul.f32 %v1474_v8, %v1055_v43  ;;  %v1062_v30 = vmul.f32 %v1476_v20, %v966_v32  ;;  %vm1068_vm6 = vweird.f32 %v1476_v20 }
 0x263   :  { %1420 = vst [vmem:[%s2601_s7 + $0x28] sm:$0xff] %v1388_v45  ;;  %1477 = vrsqrt.f32 %v967_v50  ;;  %909 = vadd.xlane.f32.xlu1 %v854_v35  ;;  %vm1069_vm8 = vmor %vm1067_vm7, %vm1068_vm6  ;;  %vm1077_vm10 = vweird.f32 %v967_v50 }
 0x264   :  { %v1060_v12 = vsel %vm1059_vm5, %v1474_v8, %v1056_v33  ;;  %v1063_v44 = vmul.f32 %v1476_v20, %v1062_v30  ;;  %v745_v60 = vpop.xlane.xlu0 %744 }
 0x265   :  { %v1317_v62 = vmul.f32 %v1060_v12, %v2142_v36  ;;  %v791_v1 = vmul.f32 %v2071_v17, %v745_v60 }
 0x266   :  { %v1064_v18 = vmul.f32 0.5, %v1063_v44  ;;  %v882_v14 = vpop.xlane.xlu2 %881 }
 0x267   :  { %v1353_v2 = vmul.f32 %v2267_v47, %v1317_v62  ;;  %v2361_v57 = vsub.f32 %v2178_v25, %v791_v1  ;;  %v936_v5 = vmul.f32 %v882_v14, %v2071_v17 }
 0x268   :  { %v1065_v49 = vsub.f32 1.5, %v1064_v18 }
 0x269   :  { %v1478_v10 = vpop.eup %1477  ;;  %v1389_v16 = vadd.f32 %v2275_v58, %v1353_v2  ;;  %v968_v8 = vadd.f32 1e-05, %v936_v5  ;;  %v855_v36 = vmul.f32 %v2361_v57, %v2361_v57 }
 0x26a   :  { %v1066_v19 = vmul.f32 %v1476_v20, %v1065_v49  ;;  %v1072_v34 = vmul.f32 %v1478_v10, %v967_v50  ;;  %vm1078_vm9 = vweird.f32 %v1478_v10 }
 0x26b   :  { %1421 = vst [vmem:[%s2601_s7 + $0x30] sm:$0xff] %v1389_v16  ;;  %1479 = vrsqrt.f32 %v968_v8  ;;  %911 = vadd.xlane.f32.xlu2 %v855_v36  ;;  %vm1079_vm11 = vmor %vm1077_vm10, %vm1078_vm9  ;;  %vm1087_vm13 = vweird.f32 %v968_v8 }
 0x26c   :  { %v1070_v25 = vsel %vm1069_vm8, %v1476_v20, %v1066_v19  ;;  %v1073_v28 = vmul.f32 %v1478_v10, %v1072_v34  ;;  %v747_v23 = vpop.xlane.xlu1 %746 }
 0x26d   :  { %v1318_v4 = vmul.f32 %v1070_v25, %v2153_v37  ;;  %v792_v52 = vmul.f32 %v2071_v17, %v747_v23 }
 0x26e   :  { %v1074_v24 = vmul.f32 0.5, %v1073_v28  ;;  %v884_v26 = vpop.xlane.xlu0 %883 }
 0x26f   :  { %v1354_v59 = vmul.f32 %v2267_v47, %v1318_v4  ;;  %v2374_v32 = vsub.f32 %v2189_v42, %v792_v52  ;;  %v937_v27 = vmul.f32 %v884_v26, %v2071_v17 }
 0x270   :  { %v1075_v29 = vsub.f32 1.5, %v1074_v24 }
 0x271   :  { %v1480_v7 = vpop.eup %1479  ;;  %v1390_v13 = vadd.f32 %v2275_v58, %v1354_v59  ;;  %v969_v43 = vadd.f32 1e-05, %v937_v27  ;;  %v856_v37 = vmul.f32 %v2374_v32, %v2374_v32 }
 0x272   :  { %v1076_v20 = vmul.f32 %v1478_v10, %v1075_v29  ;;  %v1082_v45 = vmul.f32 %v1480_v7, %v968_v8  ;;  %vm1088_vm12 = vweird.f32 %v1480_v7 }
 0x273   :  { %1422 = vst [vmem:[%s2601_s7 + $0x38] sm:$0xff] %v1390_v13  ;;  %1481 = vrsqrt.f32 %v969_v43  ;;  %913 = vadd.xlane.f32.xlu0 %v856_v37  ;;  %vm1089_vm14 = vmor %vm1087_vm13, %vm1088_vm12  ;;  %vm1097_vm0 = vweird.f32 %v969_v43 }
 0x274   :  { %v1080_v42 = vsel %vm1079_vm11, %v1478_v10, %v1076_v20  ;;  %v1083_v35 = vmul.f32 %v1480_v7, %v1082_v45  ;;  %v749_v33 = vpop.xlane.xlu2 %748 }
 0x275   :  { %v1319_v30 = vmul.f32 %v1080_v42, %v2164_v38  ;;  %v793_v12 = vmul.f32 %v2071_v17, %v749_v33 }
 0x276   :  { %v1084_v44 = vmul.f32 0.5, %v1083_v35  ;;  %v886_v60 = vpop.xlane.xlu1 %885 }
 0x277   :  { %v1355_v62 = vmul.f32 %v2267_v47, %v1319_v30  ;;  %v2387_v50 = vsub.f32 %v2200_v51, %v793_v12  ;;  %v938_v1 = vmul.f32 %v886_v60, %v2071_v17 }
 0x278   :  { %v1085_v18 = vsub.f32 1.5, %v1084_v44 }
 0x279   :  { %v1482_v14 = vpop.eup %1481  ;;  %v1391_v2 = vadd.f32 %v2275_v58, %v1355_v62  ;;  %v970_v5 = vadd.f32 1e-05, %v938_v1  ;;  %v857_v38 = vmul.f32 %v2387_v50, %v2387_v50 }
 0x27a   :  { %v1086_v49 = vmul.f32 %v1480_v7, %v1085_v18  ;;  %v1092_v10 = vmul.f32 %v1482_v14, %v969_v43  ;;  %vm1098_vm15 = vweird.f32 %v1482_v14 }
 0x27b   :  { %1423 = vst [vmem:[%s2601_s7 + $0x40] sm:$0xff] %v1391_v2  ;;  %1483 = vrsqrt.f32 %v970_v5  ;;  %915 = vadd.xlane.f32.xlu1 %v857_v38  ;;  %vm1099_vm1 = vmor %vm1097_vm0, %vm1098_vm15  ;;  %vm1107_vm3 = vweird.f32 %v970_v5 }
 0x27c   :  { %v1090_v51 = vsel %vm1089_vm14, %v1480_v7, %v1086_v49  ;;  %v1093_v16 = vmul.f32 %v1482_v14, %v1092_v10  ;;  %v751_v36 = vpop.xlane.xlu0 %750 }
 0x27d   :  { %v1320_v19 = vmul.f32 %v1090_v51, %v2175_v39  ;;  %v794_v34 = vmul.f32 %v2071_v17, %v751_v36 }
 0x27e   :  { %v1094_v25 = vmul.f32 0.5, %v1093_v16  ;;  %v888_v28 = vpop.xlane.xlu2 %887 }
 0x27f   :  { %v1356_v23 = vmul.f32 %v2267_v47, %v1320_v19  ;;  %v2400_v8 = vsub.f32 %v2211_v61, %v794_v34  ;;  %v939_v4 = vmul.f32 %v888_v28, %v2071_v17 }
 0x280   :  { %v1095_v52 = vsub.f32 1.5, %v1094_v25 }
 0x281   :  { %v1484_v24 = vpop.eup %1483  ;;  %v1392_v26 = vadd.f32 %v2275_v58, %v1356_v23  ;;  %v971_v59 = vadd.f32 1e-05, %v939_v4  ;;  %v858_v39 = vmul.f32 %v2400_v8, %v2400_v8 }
 0x282   :  { %v1096_v27 = vmul.f32 %v1482_v14, %v1095_v52  ;;  %v1102_v29 = vmul.f32 %v1484_v24, %v970_v5  ;;  %vm1108_vm2 = vweird.f32 %v1484_v24 }
 0x283   :  { %1424 = vst [vmem:[%s2601_s7 + $0x48] sm:$0xff] %v1392_v26  ;;  %1485 = vrsqrt.f32 %v971_v59  ;;  %917 = vadd.xlane.f32.xlu2 %v858_v39  ;;  %vm1109_vm4 = vmor %vm1107_vm3, %vm1108_vm2  ;;  %vm1117_vm6 = vweird.f32 %v971_v59 }
 0x284   :  { %v1100_v61 = vsel %vm1099_vm1, %v1482_v14, %v1096_v27  ;;  %v1103_v7 = vmul.f32 %v1484_v24, %v1102_v29  ;;  %v753_v13 = vpop.xlane.xlu1 %752 }
 0x285   :  { %v1321_v37 = vmul.f32 %v1100_v61, %v2186_v40  ;;  %v795_v20 = vmul.f32 %v2071_v17, %v753_v13 }
 0x286   :  { %v1104_v45 = vmul.f32 0.5, %v1103_v7  ;;  %v890_v42 = vpop.xlane.xlu0 %889 }
 0x287   :  { %v1357_v35 = vmul.f32 %v2267_v47, %v1321_v37  ;;  %v2413_v43 = vsub.f32 %v2222_v6, %v795_v20  ;;  %v940_v33 = vmul.f32 %v890_v42, %v2071_v17 }
 0x288   :  { %v1105_v30 = vsub.f32 1.5, %v1104_v45 }
 0x289   :  { %v1486_v12 = vpop.eup %1485  ;;  %v1393_v44 = vadd.f32 %v2275_v58, %v1357_v35  ;;  %v972_v60 = vadd.f32 1e-05, %v940_v33  ;;  %v859_v40 = vmul.f32 %v2413_v43, %v2413_v43 }
 0x28a   :  { %v1106_v62 = vmul.f32 %v1484_v24, %v1105_v30  ;;  %v1112_v1 = vmul.f32 %v1486_v12, %v971_v59  ;;  %vm1118_vm5 = vweird.f32 %v1486_v12 }
 0x28b   :  { %1425 = vst [vmem:[%s2601_s7 + $0x50] sm:$0xff] %v1393_v44  ;;  %1487 = vrsqrt.f32 %v972_v60  ;;  %919 = vadd.xlane.f32.xlu0 %v859_v40  ;;  %vm1119_vm7 = vmor %vm1117_vm6, %vm1118_vm5  ;;  %vm1127_vm9 = vweird.f32 %v972_v60 }
 0x28c   :  { %v1110_v6 = vsel %vm1109_vm4, %v1484_v24, %v1106_v62  ;;  %v1113_v18 = vmul.f32 %v1486_v12, %v1112_v1  ;;  %v755_v14 = vpop.xlane.xlu2 %754 }
 0x28d   :  { %v1322_v2 = vmul.f32 %v1110_v6, %v2197_v46  ;;  %v796_v38 = vmul.f32 %v2071_v17, %v755_v14 }
 0x28e   :  { %v1114_v49 = vmul.f32 0.5, %v1113_v18 }
 0x28f   :  { %v1358_v10 = vmul.f32 %v2267_v47, %v1322_v2  ;;  %v2426_v5 = vsub.f32 %v2229_v31, %v796_v38 }
 0x290   :  { %v1115_v51 = vsub.f32 1.5, %v1114_v49 }
 0x291   :  { %v1488_v16 = vpop.eup %1487  ;;  %v1394_v36 = vadd.f32 %v2275_v58, %v1358_v10  ;;  %v860_v19 = vmul.f32 %v2426_v5, %v2426_v5 }
 0x292   :  { %v1116_v34 = vmul.f32 %v1486_v12, %v1115_v51  ;;  %v1122_v25 = vmul.f32 %v1488_v16, %v972_v60  ;;  %vm1128_vm8 = vweird.f32 %v1488_v16 }
 0x293   :  { %1426 = vst [vmem:[%s2601_s7 + $0x58] sm:$0xff] %v1394_v36  ;;  %921 = vadd.xlane.f32.xlu1 %v860_v19  ;;  %vm1129_vm10 = vmor %vm1127_vm9, %vm1128_vm8 }
 0x294   :  { %v1120_v46 = vsel %vm1119_vm7, %v1486_v12, %v1116_v34  ;;  %v1123_v31 = vmul.f32 %v1488_v16, %v1122_v25  ;;  %v757_v28 = vpop.xlane.xlu0 %756 }
 0x295   :  { %v1323_v23 = vmul.f32 %v1120_v46, %v2208_v55  ;;  %v797_v4 = vmul.f32 %v2071_v17, %v757_v28 }
 0x296   :  { %v1124_v52 = vmul.f32 0.5, %v1123_v31  ;;  %v894_v24 = vpop.xlane.xlu2 %893 }
 0x297   :  { %v1359_v26 = vmul.f32 %v2267_v47, %v1323_v23  ;;  %v2438_v59 = vsub.f32 %v2239_v56, %v797_v4  ;;  %v942_v39 = vmul.f32 %v894_v24, %v2071_v17 }
 0x298   :  { %v1125_v27 = vsub.f32 1.5, %v1124_v52 }
 0x299   :  { %v1395_v29 = vadd.f32 %v2275_v58, %v1359_v26  ;;  %v974_v61 = vadd.f32 1e-05, %v942_v39  ;;  %v861_v7 = vmul.f32 %v2438_v59, %v2438_v59 }
 0x29a   :  { %v1126_v55 = vmul.f32 %v1488_v16, %v1125_v27 }
 0x29b   :  { %1427 = vst [vmem:[%s2601_s7 + $0x60] sm:$0xff] %v1395_v29  ;;  %1489 = vrsqrt.f32 %v974_v61  ;;  %923 = vadd.xlane.f32.xlu2 %v861_v7  ;;  %vm1147_vm12 = vweird.f32 %v974_v61 }
 0x29c   :  { %v1130_v56 = vsel %vm1129_vm10, %v1488_v16, %v1126_v55  ;;  %v759_v13 = vpop.xlane.xlu1 %758 }
 0x29d   :  { %v1324_v37 = vmul.f32 %v1130_v56, %v2219_v63  ;;  %v798_v20 = vmul.f32 %v2071_v17, %v759_v13 }
 0x29e   :  { %v896_v45 = vpop.xlane.xlu0 %895 }
 0x29f   :  { %v1360_v42 = vmul.f32 %v2267_v47, %v1324_v37  ;;  %v2451_v35 = vsub.f32 %v2252_v9, %v798_v20  ;;  %v943_v33 = vmul.f32 %v896_v45, %v2071_v17 }
 0x2a1   :  { %v1490_v30 = vpop.eup %1489  ;;  %v1396_v12 = vadd.f32 %v2275_v58, %v1360_v42  ;;  %v975_v44 = vadd.f32 1e-05, %v943_v33  ;;  %v862_v60 = vmul.f32 %v2451_v35, %v2451_v35 }
 0x2a2   :  { %v1142_v40 = vmul.f32 %v1490_v30, %v974_v61  ;;  %vm1148_vm11 = vweird.f32 %v1490_v30 }
 0x2a3   :  { %1428 = vst [vmem:[%s2601_s7 + $0x68] sm:$0xff] %v1396_v12  ;;  %1491 = vrsqrt.f32 %v975_v44  ;;  %925 = vadd.xlane.f32.xlu0 %v862_v60  ;;  %vm1149_vm13 = vmor %vm1147_vm12, %vm1148_vm11  ;;  %vm1157_vm15 = vweird.f32 %v975_v44 }
 0x2a4   :  { %v1143_v63 = vmul.f32 %v1490_v30, %v1142_v40  ;;  %v892_v62 = vpop.xlane.xlu1 %891 }
 0x2a5   :  { %v941_v9 = vmul.f32 %v892_v62, %v2071_v17 }
 0x2a6   :  { %v1144_v1 = vmul.f32 0.5, %v1143_v63 }
 0x2a7   :  { %v973_v6 = vadd.f32 1e-05, %v941_v9 }
 0x2a8   :  { %v1145_v18 = vsub.f32 1.5, %v1144_v1 }
 0x2a9   :  { %v1492_v14 = vpop.eup %1491  ;;  %1493 = vrsqrt.f32 %v973_v6  ;;  %vm1137_vm2 = vweird.f32 %v973_v6 }
 0x2aa   :  { %v1146_v2 = vmul.f32 %v1490_v30, %v1145_v18  ;;  %v1152_v38 = vmul.f32 %v1492_v14, %v975_v44  ;;  %vm1158_vm14 = vweird.f32 %v1492_v14 }
 0x2ab   :  { %vm1159_vm0 = vmor %vm1157_vm15, %vm1158_vm14 }
 0x2ac   :  { %v1150_v49 = vsel %vm1149_vm13, %v1490_v30, %v1146_v2  ;;  %v1153_v10 = vmul.f32 %v1492_v14, %v1152_v38  ;;  %v898_v51 = vpop.xlane.xlu1 %897 }
 0x2ad   :  { %v1326_v16 = vmul.f32 %v1150_v49, %v2235_v53  ;;  %v944_v36 = vmul.f32 %v898_v51, %v2071_v17 }
 0x2ae   :  { %v1154_v19 = vmul.f32 0.5, %v1153_v10  ;;  %v900_v34 = vpop.xlane.xlu2 %899 }
 0x2af   :  { %v1494_v25 = vpop.eup %1493  ;;  %v1362_v46 = vmul.f32 %v2267_v47, %v1326_v16  ;;  %v976_v31 = vadd.f32 1e-05, %v944_v36  ;;  %v945_v28 = vmul.f32 %v900_v34, %v2071_v17 }
 0x2b0   :  { %v1155_v23 = vsub.f32 1.5, %v1154_v19  ;;  %v1132_v4 = vmul.f32 %v1494_v25, %v973_v6  ;;  %vm1138_vm1 = vweird.f32 %v1494_v25 }
 0x2b1   :  { %v1398_v52 = vadd.f32 %v2275_v58, %v1362_v46  ;;  %1495 = vrsqrt.f32 %v976_v31  ;;  %v977_v24 = vadd.f32 1e-05, %v945_v28  ;;  %vm1139_vm3 = vmor %vm1137_vm2, %vm1138_vm1  ;;  %vm1167_vm5 = vweird.f32 %v976_v31 }
 0x2b2   :  { %v1156_v26 = vmul.f32 %v1492_v14, %v1155_v23  ;;  %v1133_v53 = vmul.f32 %v1494_v25, %v1132_v4 }
 0x2b3   :  { %1430 = vst [vmem:[%s2601_s7 + $0x78] sm:$0xff] %v1398_v52  ;;  %1497 = vrsqrt.f32 %v977_v24  ;;  %vm1177_vm8 = vweird.f32 %v977_v24 }
 0x2b4   :  { %v1160_v39 = vsel %vm1159_vm0, %v1492_v14, %v1156_v26  ;;  %v1134_v27 = vmul.f32 0.5, %v1133_v53 }
 0x2b5   :  { %v1327_v29 = vmul.f32 %v1160_v39, %v2248_v0 }
 0x2b6   :  { %v1135_v61 = vsub.f32 1.5, %v1134_v27  ;;  %v902_v7 = vpop.xlane.xlu0 %901 }
 0x2b7   :  { %v1496_v55 = vpop.eup %1495  ;;  %v1363_v56 = vmul.f32 %v2267_v47, %v1327_v29  ;;  %v946_v13 = vmul.f32 %v902_v7, %v2071_v17 }
 0x2b8   :  { %v1136_v37 = vmul.f32 %v1494_v25, %v1135_v61  ;;  %v1162_v20 = vmul.f32 %v1496_v55, %v976_v31  ;;  %vm1168_vm4 = vweird.f32 %v1496_v55 }
 0x2b9   :  { %v1498_v45 = vpop.eup %1497  ;;  %v1399_v42 = vadd.f32 %v2275_v58, %v1363_v56  ;;  %v978_v33 = vadd.f32 1e-05, %v946_v13  ;;  %vm1169_vm7 = vmor %vm1167_vm5, %vm1168_vm4 }
 0x2ba   :  { %v1140_v30 = vsel %vm1139_vm3, %v1494_v25, %v1136_v37  ;;  %v1163_v12 = vmul.f32 %v1496_v55, %v1162_v20  ;;  %v1172_v44 = vmul.f32 %v1498_v45, %v977_v24  ;;  %vm1178_vm6 = vweird.f32 %v1498_v45 }
 0x2bb   :  { %1431 = vst [vmem:[%s2601_s7 + $0x80] sm:$0xff] %v1399_v42  ;;  %v1325_v0 = vmul.f32 %v1140_v30, %v2258_v22  ;;  %1499 = vrsqrt.f32 %v978_v33  ;;  %vm1179_vm9 = vmor %vm1177_vm8, %vm1178_vm6  ;;  %vm1187_vm11 = vweird.f32 %v978_v33 }
 0x2bc   :  { %v1164_v60 = vmul.f32 0.5, %v1163_v12  ;;  %v1173_v40 = vmul.f32 %v1498_v45, %v1172_v44 }
 0x2bd   :  { %v1361_v63 = vmul.f32 %v2267_v47, %v1325_v0 }
 0x2be   :  { %v1165_v62 = vsub.f32 1.5, %v1164_v60  ;;  %v1174_v9 = vmul.f32 0.5, %v1173_v40  ;;  %v904_v1 = vpop.xlane.xlu1 %903 }
 0x2bf   :  { %v1397_v6 = vadd.f32 %v2275_v58, %v1361_v63  ;;  %v947_v18 = vmul.f32 %v904_v1, %v2071_v17 }
 0x2c0   :  { %v1166_v14 = vmul.f32 %v1496_v55, %v1165_v62  ;;  %v1175_v2 = vsub.f32 1.5, %v1174_v9 }
 0x2c1   :  { %v1500_v38 = vpop.eup %1499  ;;  %1429 = vst [vmem:[%s2601_s7 + $0x70] sm:$0xff] %v1397_v6  ;;  %v979_v22 = vadd.f32 1e-05, %v947_v18 }
 0x2c2   :  { %v1170_v49 = vsel %vm1169_vm7, %v1496_v55, %v1166_v14  ;;  %v1176_v10 = vmul.f32 %v1498_v45, %v1175_v2  ;;  %v1182_v51 = vmul.f32 %v1500_v38, %v978_v33  ;;  %vm1188_vm10 = vweird.f32 %v1500_v38 }
 0x2c3   :  { %v1328_v16 = vmul.f32 %v1170_v49, %v2270_v48  ;;  %1501 = vrsqrt.f32 %v979_v22  ;;  %vm1189_vm12 = vmor %vm1187_vm11, %vm1188_vm10  ;;  %vm1197_vm14 = vweird.f32 %v979_v22 }
 0x2c4   :  { %v1180_v36 = vsel %vm1179_vm9, %v1498_v45, %v1176_v10  ;;  %v1183_v19 = vmul.f32 %v1500_v38, %v1182_v51 }
 0x2c5   :  { %v1364_v34 = vmul.f32 %v2267_v47, %v1328_v16  ;;  %v1329_v25 = vmul.f32 %v1180_v36, %v2281_v21 }
 0x2c6   :  { %v1184_v46 = vmul.f32 0.5, %v1183_v19  ;;  %v906_v31 = vpop.xlane.xlu2 %905 }
 0x2c7   :  { %v1400_v28 = vadd.f32 %v2275_v58, %v1364_v34  ;;  %v1365_v23 = vmul.f32 %v2267_v47, %v1329_v25  ;;  %v948_v4 = vmul.f32 %v906_v31, %v2071_v17 }
 0x2c8   :  { %v1185_v52 = vsub.f32 1.5, %v1184_v46 }
 0x2c9   :  { %v1502_v24 = vpop.eup %1501  ;;  %1432 = vst [vmem:[%s2601_s7 + $0x88] sm:$0xff] %v1400_v28  ;;  %v1401_v48 = vadd.f32 %v2275_v58, %v1365_v23  ;;  %v980_v26 = vadd.f32 1e-05, %v948_v4 }
 0x2ca   :  { %v1186_v53 = vmul.f32 %v1500_v38, %v1185_v52  ;;  %v1192_v21 = vmul.f32 %v1502_v24, %v979_v22  ;;  %vm1198_vm13 = vweird.f32 %v1502_v24 }
 0x2cb   :  { %1433 = vst [vmem:[%s2601_s7 + $0x90] sm:$0xff] %v1401_v48  ;;  %1503 = vrsqrt.f32 %v980_v26  ;;  %vm1199_vm15 = vmor %vm1197_vm14, %vm1198_vm13  ;;  %vm1207_vm1 = vweird.f32 %v980_v26 }
 0x2cc   :  { %v1190_v39 = vsel %vm1189_vm12, %v1500_v38, %v1186_v53  ;;  %v1193_v27 = vmul.f32 %v1502_v24, %v1192_v21 }
 0x2cd   :  { %v1330_v29 = vmul.f32 %v1190_v39, %v2296_v11 }
 0x2ce   :  { %v1194_v61 = vmul.f32 0.5, %v1193_v27  ;;  %v908_v7 = vpop.xlane.xlu0 %907 }
 0x2cf   :  { %v1366_v55 = vmul.f32 %v2267_v47, %v1330_v29  ;;  %v949_v56 = vmul.f32 %v908_v7, %v2071_v17 }
 0x2d0   :  { %v1195_v13 = vsub.f32 1.5, %v1194_v61 }
 0x2d1   :  { %v1504_v37 = vpop.eup %1503  ;;  %v1402_v20 = vadd.f32 %v2275_v58, %v1366_v55  ;;  %v981_v45 = vadd.f32 1e-05, %v949_v56 }
 0x2d2   :  { %v1196_v42 = vmul.f32 %v1502_v24, %v1195_v13  ;;  %v1202_v33 = vmul.f32 %v1504_v37, %v980_v26  ;;  %vm1208_vm0 = vweird.f32 %v1504_v37 }
 0x2d3   :  { %1434 = vst [vmem:[%s2601_s7 + $0x98] sm:$0xff] %v1402_v20  ;;  %1505 = vrsqrt.f32 %v981_v45  ;;  %vm1209_vm2 = vmor %vm1207_vm1, %vm1208_vm0  ;;  %vm1217_vm4 = vweird.f32 %v981_v45 }
 0x2d4   :  { %v1200_v11 = vsel %vm1199_vm15, %v1502_v24, %v1196_v42  ;;  %v1203_v30 = vmul.f32 %v1504_v37, %v1202_v33 }
 0x2d5   :  { %v1331_v12 = vmul.f32 %v1200_v11, %v2309_v41 }
 0x2d6   :  { %v1204_v44 = vmul.f32 0.5, %v1203_v30  ;;  %v910_v0 = vpop.xlane.xlu1 %909 }
 0x2d7   :  { %v1367_v60 = vmul.f32 %v2267_v47, %v1331_v12  ;;  %v950_v40 = vmul.f32 %v910_v0, %v2071_v17 }
 0x2d8   :  { %v1205_v63 = vsub.f32 1.5, %v1204_v44 }
 0x2d9   :  { %v1506_v62 = vpop.eup %1505  ;;  %v1403_v9 = vadd.f32 %v2275_v58, %v1367_v60  ;;  %v982_v1 = vadd.f32 1e-05, %v950_v40 }
 0x2da   :  { %v1206_v6 = vmul.f32 %v1504_v37, %v1205_v63  ;;  %v1212_v18 = vmul.f32 %v1506_v62, %v981_v45  ;;  %vm1218_vm3 = vweird.f32 %v1506_v62  ;;  %v2542_v63 = vld [vmem:[%s2600_s6] ss:$0 sm:$0xff] }
 0x2db   :  { %1435 = vst [vmem:[%s2601_s7 + $0xa0] sm:$0xff] %v1403_v9  ;;  %1507 = vrsqrt.f32 %v982_v1  ;;  %vm1219_vm5 = vmor %vm1217_vm4, %vm1218_vm3  ;;  %vm1227_vm7 = vweird.f32 %v982_v1 }
 0x2dc   :  { %v1210_v41 = vsel %vm1209_vm2, %v1504_v37, %v1206_v6  ;;  %v1213_v14 = vmul.f32 %v1506_v62, %v1212_v18 }
 0x2dd   :  { %v1332_v2 = vmul.f32 %v1210_v41, %v2322_v3 }
 0x2de   :  { %v1214_v38 = vmul.f32 0.5, %v1213_v14  ;;  %v912_v22 = vpop.xlane.xlu2 %911 }
 0x2df   :  { %v1368_v49 = vmul.f32 %v2267_v47, %v1332_v2  ;;  %v951_v10 = vmul.f32 %v912_v22, %v2071_v17 }
 0x2e0   :  { %v1215_v51 = vsub.f32 1.5, %v1214_v38 }
 0x2e1   :  { %v1508_v16 = vpop.eup %1507  ;;  %v1404_v36 = vadd.f32 %v2275_v58, %v1368_v49  ;;  %v983_v19 = vadd.f32 1e-05, %v951_v10 }
 0x2e2   :  { %v1216_v34 = vmul.f32 %v1506_v62, %v1215_v51  ;;  %v1222_v25 = vmul.f32 %v1508_v16, %v982_v1  ;;  %vm1228_vm6 = vweird.f32 %v1508_v16 }
 0x2e3   :  { %1436 = vst [vmem:[%s2601_s7 + $0xa8] sm:$0xff] %v1404_v36  ;;  %1509 = vrsqrt.f32 %v983_v19  ;;  %vm1229_vm8 = vmor %vm1227_vm7, %vm1228_vm6  ;;  %vm1237_vm10 = vweird.f32 %v983_v19 }
 0x2e4   :  { %v1220_v3 = vsel %vm1219_vm5, %v1506_v62, %v1216_v34  ;;  %v1223_v46 = vmul.f32 %v1508_v16, %v1222_v25 }
 0x2e5   :  { %v1333_v31 = vmul.f32 %v1220_v3, %v2335_v54 }
 0x2e6   :  { %v1224_v28 = vmul.f32 0.5, %v1223_v46  ;;  %v914_v23 = vpop.xlane.xlu0 %913 }
 0x2e7   :  { %v1369_v4 = vmul.f32 %v2267_v47, %v1333_v31  ;;  %v952_v52 = vmul.f32 %v914_v23, %v2071_v17 }
 0x2e8   :  { %v1225_v24 = vsub.f32 1.5, %v1224_v28 }
 0x2e9   :  { %v1510_v48 = vpop.eup %1509  ;;  %v1405_v26 = vadd.f32 %v2275_v58, %v1369_v4  ;;  %v984_v53 = vadd.f32 1e-05, %v952_v52 }
 0x2ea   :  { %v1226_v21 = vmul.f32 %v1508_v16, %v1225_v24  ;;  %v1232_v39 = vmul.f32 %v1510_v48, %v983_v19  ;;  %vm1238_vm9 = vweird.f32 %v1510_v48 }
 0x2eb   :  { %1437 = vst [vmem:[%s2601_s7 + $0xb0] sm:$0xff] %v1405_v26  ;;  %1511 = vrsqrt.f32 %v984_v53  ;;  %vm1239_vm11 = vmor %vm1237_vm10, %vm1238_vm9  ;;  %vm1247_vm13 = vweird.f32 %v984_v53 }
 0x2ec   :  { %v1230_v54 = vsel %vm1229_vm8, %v1508_v16, %v1226_v21  ;;  %v1233_v27 = vmul.f32 %v1510_v48, %v1232_v39 }
 0x2ed   :  { %v1334_v29 = vmul.f32 %v1230_v54, %v2348_v15 }
 0x2ee   :  { %v1234_v61 = vmul.f32 0.5, %v1233_v27  ;;  %v916_v7 = vpop.xlane.xlu1 %915 }
 0x2ef   :  { %v1370_v55 = vmul.f32 %v2267_v47, %v1334_v29  ;;  %v953_v56 = vmul.f32 %v916_v7, %v2071_v17 }
 0x2f0   :  { %v1235_v13 = vsub.f32 1.5, %v1234_v61 }
 0x2f1   :  { %v1512_v37 = vpop.eup %1511  ;;  %v1406_v20 = vadd.f32 %v2275_v58, %v1370_v55  ;;  %v985_v45 = vadd.f32 1e-05, %v953_v56  ;;  %v2535_v58 = vld [vmem:[%s2599_s5] ss:$0 sm:$0xff] }
 0x2f2   :  { %v1236_v42 = vmul.f32 %v1510_v48, %v1235_v13  ;;  %v1242_v33 = vmul.f32 %v1512_v37, %v984_v53  ;;  %vm1248_vm12 = vweird.f32 %v1512_v37 }
 0x2f3   :  { %1438 = vst [vmem:[%s2601_s7 + $0xb8] sm:$0xff] %v1406_v20  ;;  %1513 = vrsqrt.f32 %v985_v45  ;;  %vm1249_vm14 = vmor %vm1247_vm13, %vm1248_vm12  ;;  %vm1257_vm0 = vweird.f32 %v985_v45 }
 0x2f4   :  { %v1240_v15 = vsel %vm1239_vm11, %v1510_v48, %v1236_v42  ;;  %v1243_v11 = vmul.f32 %v1512_v37, %v1242_v33 }
 0x2f5   :  { %v1335_v47 = vmul.f32 %v1240_v15, %v2361_v57 }
 0x2f6   :  { %v1244_v30 = vmul.f32 0.5, %v1243_v11  ;;  %v918_v12 = vpop.xlane.xlu2 %917 }
 0x2f7   :  { %v1371_v44 = vmul.f32 %v2535_v58, %v1335_v47  ;;  %v954_v0 = vmul.f32 %v918_v12, %v2071_v17 }
 0x2f8   :  { %v1245_v60 = vsub.f32 1.5, %v1244_v30 }
 0x2f9   :  { %v1514_v40 = vpop.eup %1513  ;;  %v1407_v57 = vadd.f32 %v2542_v63, %v1371_v44  ;;  %v986_v62 = vadd.f32 1e-05, %v954_v0 }
 0x2fa   :  { %v1246_v9 = vmul.f32 %v1512_v37, %v1245_v60  ;;  %v1252_v1 = vmul.f32 %v1514_v40, %v985_v45  ;;  %vm1258_vm15 = vweird.f32 %v1514_v40 }
 0x2fb   :  { %1439 = vst [vmem:[%s2601_s7 + $0xc0] sm:$0xff] %v1407_v57  ;;  %1515 = vrsqrt.f32 %v986_v62  ;;  %vm1259_vm1 = vmor %vm1257_vm0, %vm1258_vm15  ;;  %vm1267_vm3 = vweird.f32 %v986_v62 }
 0x2fc   :  { %v1250_v6 = vsel %vm1249_vm14, %v1512_v37, %v1246_v9  ;;  %v1253_v18 = vmul.f32 %v1514_v40, %v1252_v1 }
 0x2fd   :  { %v1336_v41 = vmul.f32 %v1250_v6, %v2374_v32 }
 0x2fe   :  { %v1254_v14 = vmul.f32 0.5, %v1253_v18  ;;  %v920_v2 = vpop.xlane.xlu0 %919 }
 0x2ff   :  { %v1372_v38 = vmul.f32 %v2535_v58, %v1336_v41  ;;  %v955_v22 = vmul.f32 %v920_v2, %v2071_v17 }
 0x300   :  { %v1255_v49 = vsub.f32 1.5, %v1254_v14 }
 0x301   :  { %v1516_v10 = vpop.eup %1515  ;;  %v1408_v51 = vadd.f32 %v2542_v63, %v1372_v38  ;;  %v987_v16 = vadd.f32 1e-05, %v955_v22 }
 0x302   :  { %v1256_v36 = vmul.f32 %v1514_v40, %v1255_v49  ;;  %v1262_v19 = vmul.f32 %v1516_v10, %v986_v62  ;;  %vm1268_vm2 = vweird.f32 %v1516_v10 }
 0x303   :  { %1440 = vst [vmem:[%s2601_s7 + $0xc8] sm:$0xff] %v1408_v51  ;;  %1517 = vrsqrt.f32 %v987_v16  ;;  %vm1269_vm4 = vmor %vm1267_vm3, %vm1268_vm2  ;;  %vm1277_vm6 = vweird.f32 %v987_v16 }
 0x304   :  { %v1260_v32 = vsel %vm1259_vm1, %v1514_v40, %v1256_v36  ;;  %v1263_v34 = vmul.f32 %v1516_v10, %v1262_v19 }
 0x305   :  { %v1337_v25 = vmul.f32 %v1260_v32, %v2387_v50 }
 0x306   :  { %v1264_v3 = vmul.f32 0.5, %v1263_v34  ;;  %v922_v46 = vpop.xlane.xlu1 %921 }
 0x307   :  { %v1373_v31 = vmul.f32 %v2535_v58, %v1337_v25  ;;  %v956_v28 = vmul.f32 %v922_v46, %v2071_v17 }
 0x308   :  { %v1265_v23 = vsub.f32 1.5, %v1264_v3 }
 0x309   :  { %v1518_v4 = vpop.eup %1517  ;;  %v1409_v52 = vadd.f32 %v2542_v63, %v1373_v31  ;;  %v988_v24 = vadd.f32 1e-05, %v956_v28 }
 0x30a   :  { %v1266_v48 = vmul.f32 %v1516_v10, %v1265_v23  ;;  %v1272_v26 = vmul.f32 %v1518_v4, %v987_v16  ;;  %vm1278_vm5 = vweird.f32 %v1518_v4 }
 0x30b   :  { %1441 = vst [vmem:[%s2601_s7 + $0xd0] sm:$0xff] %v1409_v52  ;;  %1519 = vrsqrt.f32 %v988_v24  ;;  %vm1279_vm7 = vmor %vm1277_vm6, %vm1278_vm5  ;;  %vm1287_vm9 = vweird.f32 %v988_v24 }
 0x30c   :  { %v1270_v50 = vsel %vm1269_vm4, %v1516_v10, %v1266_v48  ;;  %v1273_v53 = vmul.f32 %v1518_v4, %v1272_v26 }
 0x30d   :  { %v1338_v21 = vmul.f32 %v1270_v50, %v2400_v8 }
 0x30e   :  { %v1274_v39 = vmul.f32 0.5, %v1273_v53  ;;  %v924_v54 = vpop.xlane.xlu2 %923 }
 0x30f   :  { %v1374_v27 = vmul.f32 %v2535_v58, %v1338_v21  ;;  %v957_v29 = vmul.f32 %v924_v54, %v2071_v17 }
 0x310   :  { %v1275_v61 = vsub.f32 1.5, %v1274_v39 }
 0x311   :  { %v1520_v7 = vpop.eup %1519  ;;  %v1410_v55 = vadd.f32 %v2542_v63, %v1374_v27  ;;  %v989_v56 = vadd.f32 1e-05, %v957_v29 }
 0x312   :  { %v1276_v13 = vmul.f32 %v1518_v4, %v1275_v61  ;;  %v1282_v37 = vmul.f32 %v1520_v7, %v988_v24  ;;  %vm1288_vm8 = vweird.f32 %v1520_v7 }
 0x313   :  { %1442 = vst [vmem:[%s2601_s7 + $0xd8] sm:$0xff] %v1410_v55  ;;  %1521 = vrsqrt.f32 %v989_v56  ;;  %vm1289_vm10 = vmor %vm1287_vm9, %vm1288_vm8  ;;  %vm1297_vm12 = vweird.f32 %v989_v56 }
 0x314   :  { %v1280_v8 = vsel %vm1279_vm7, %v1518_v4, %v1276_v13  ;;  %v1283_v20 = vmul.f32 %v1520_v7, %v1282_v37 }
 0x315   :  { %v1339_v45 = vmul.f32 %v1280_v8, %v2413_v43 }
 0x316   :  { %v1284_v42 = vmul.f32 0.5, %v1283_v20  ;;  %v926_v33 = vpop.xlane.xlu0 %925 }
 0x317   :  { %v1375_v15 = vmul.f32 %v2535_v58, %v1339_v45  ;;  %v958_v11 = vmul.f32 %v926_v33, %v2071_v17 }
 0x318   :  { %v1285_v47 = vsub.f32 1.5, %v1284_v42 }
 0x319   :  { %v1522_v30 = vpop.eup %1521  ;;  %v1411_v12 = vadd.f32 %v2542_v63, %v1375_v15  ;;  %v990_v44 = vadd.f32 1e-05, %v958_v11 }
 0x31a   :  { %v1286_v0 = vmul.f32 %v1520_v7, %v1285_v47  ;;  %v1292_v60 = vmul.f32 %v1522_v30, %v989_v56  ;;  %vm1298_vm11 = vweird.f32 %v1522_v30 }
 0x31b   :  { %1443 = vst [vmem:[%s2601_s7 + $0xe0] sm:$0xff] %v1411_v12  ;;  %1523 = vrsqrt.f32 %v990_v44  ;;  %vm1299_vm13 = vmor %vm1297_vm12, %vm1298_vm11  ;;  %vm1307_vm15 = vweird.f32 %v990_v44 }
 0x31c   :  { %v1290_v43 = vsel %vm1289_vm10, %v1520_v7, %v1286_v0  ;;  %v1293_v40 = vmul.f32 %v1522_v30, %v1292_v60 }
 0x31d   :  { %v1340_v57 = vmul.f32 %v1290_v43, %v2426_v5 }
 0x31e   :  { %v1294_v17 = vmul.f32 0.5, %v1293_v40 }
 0x31f   :  { %v1376_v62 = vmul.f32 %v2535_v58, %v1340_v57 }
 0x320   :  { %v1295_v9 = vsub.f32 1.5, %v1294_v17 }
 0x321   :  { %v1524_v1 = vpop.eup %1523  ;;  %v1412_v6 = vadd.f32 %v2542_v63, %v1376_v62 }
 0x322   :  { %v1296_v18 = vmul.f32 %v1522_v30, %v1295_v9  ;;  %v1302_v41 = vmul.f32 %v1524_v1, %v990_v44  ;;  %vm1308_vm14 = vweird.f32 %v1524_v1 }
 0x323   :  { %1444 = vst [vmem:[%s2601_s7 + $0xe8] sm:$0xff] %v1412_v6  ;;  %vm1309_vm0 = vmor %vm1307_vm15, %vm1308_vm14 }
 0x324   :  { %v1300_v14 = vsel %vm1299_vm13, %v1522_v30, %v1296_v18  ;;  %v1303_v2 = vmul.f32 %v1524_v1, %v1302_v41 }
 0x325   :  { %v1341_v5 = vmul.f32 %v1300_v14, %v2438_v59 }
 0x326   :  { %v1304_v38 = vmul.f32 0.5, %v1303_v2 }
 0x327   :  { %v1377_v22 = vmul.f32 %v2535_v58, %v1341_v5 }
 0x328   :  { %v1305_v49 = vsub.f32 1.5, %v1304_v38 }
 0x329   :  { %v1413_v10 = vadd.f32 %v2542_v63, %v1377_v22 }
 0x32a   :  { %v1306_v51 = vmul.f32 %v1524_v1, %v1305_v49 }
 0x32b   :  { %1445 = vst [vmem:[%s2601_s7 + $0xf0] sm:$0xff] %v1413_v10 }
 0x32c   :  { %v1310_v16 = vsel %vm1309_vm0, %v1524_v1, %v1306_v51 }
 0x32d   :  { %v1342_v36 = vmul.f32 %v1310_v16, %v2451_v35 }
 0x32f   :  { %v1378_v19 = vmul.f32 %v2535_v58, %v1342_v36 }
 0x331   :  { %v1414_v59 = vadd.f32 %v2542_v63, %v1378_v19 }
 0x333   :  { %1446 = vst [vmem:[%s2601_s7 + $0xf8] sm:$0xff] %v1414_v59 }
 0x334   :  { %1451 = vsyncpa [#allocation3], 1 }

</bundles_post_ra>
